<compile_context>
chip_gen: v7x
topology: tpu7x:2x2x1
jax: 0.10.0
libtpu: 0.0.40
codegen_flags: <defaults>
</compile_context>

<pallas_src>
import functools

import jax
import jax.numpy as jnp
from jax import lax
from jax.experimental import pallas as pl
from jax.experimental.pallas import tpu as pltpu

LEAKY_SLOPE = 0.01   # nn.LeakyReLU slope used inside the SCINet conv blocks
BN_EPS = 1e-5


def _pads(k):
    """ReplicationPad1d sizes used by SCINet conv modules."""
    if k % 2 == 0:
        return (k - 2) // 2 + 1, k // 2 + 1
    p = (k - 1) // 2 + 1
    return p, p


def _round_up(x, m):
    return ((x + m - 1) // m) * m


# ----------------------------------------------------------------------------
# Static slab layout (shared by pack_params and the kernel builder)
# ----------------------------------------------------------------------------

def _slab_layout(*, B, D, T, O, num_levels, k, hidden_size):
    """Row/col placement of every packed parameter inside the single f32 slab."""
    pad_l, pad_r = _pads(k)
    ch = D * hidden_size
    BD = B * D
    entries = [("bn1", BD, 2)]
    for lvl in range(num_levels):
        n = 1 << lvl                      # tree nodes at this level
        ni = 2 * n * B                    # conv instances per stage (phi&psi | U&P)
        L = T >> lvl
        Lh = L >> 1
        lpad = Lh + pad_l + pad_r
        entries += [
            ("w1_%d" % lvl, 2 * ni * ch, k * ni * D),
            ("b1_%d" % lvl, 2 * ni * ch, 1),
            ("w2_%d" % lvl, 2 * ni * D, 3 * ni * ch),
            ("b2_%d" % lvl, 2 * ni * D, 1),
            ("sel_%d" % lvl, L, 2 * lpad),     # merged even|odd select+pad matrix
            ("pad_%d" % lvl, Lh, lpad),        # stage-B replication-pad matrix
        ]
    entries += [
        ("bn2", BD, 2),
        ("wt_perm", T, O),                      # row-permuted time projector
        ("wcb", B, BD),                         # block-diag channel projector
        ("bc_cum", 1, O),                       # cumsum'd channel-proj bias
        ("tri", O, O),                          # cumsum upper-triangular matrix
    ]
    layout = {}
    off = 0
    width = 0
    for name, r, c in entries:
        layout[name] = (off, r, c)
        off += _round_up(r, 8)                  # keep every block 8-sublane aligned
        width = max(width, c)
    return layout, _round_up(off, 8), _round_up(width, 128)


# ----------------------------------------------------------------------------
# Pack-time constant builders (run once outside the kernel)
# ----------------------------------------------------------------------------

def _sel_pad_const(L, Lh, pad_l, pad_r, parity):
    """(L, Lh+pad) matrix: right-multiply selects the even/odd time subsequence
    AND applies replication padding in one matmul."""
    lpad = Lh + pad_l + pad_r
    r = lax.broadcasted_iota(jnp.int32, (L, lpad), 0)
    c = lax.broadcasted_iota(jnp.int32, (L, lpad), 1)
    src = jnp.clip(c - pad_l, 0, Lh - 1) * 2 + parity
    return (r == src).astype(jnp.float32)


def _pad_const(Lh, pad_l, pad_r):
    """(Lh, Lh+pad) replication-padding matrix (per-row edge values)."""
    lpad = Lh + pad_l + pad_r
    r = lax.broadcasted_iota(jnp.int32, (Lh, lpad), 0)
    c = lax.broadcasted_iota(jnp.int32, (Lh, lpad), 1)
    src = jnp.clip(c - pad_l, 0, Lh - 1)
    return (r == src).astype(jnp.float32)


# ----------------------------------------------------------------------------
# In-kernel stacked conv block
# ----------------------------------------------------------------------------

def _conv_stage(xpad, w1, b1, w2, b2, k, l_out):
    """One stacked SCINet conv block (all nodes / modules / batches at once):
    Conv1d(k) -> LeakyReLU -> [Dropout == id] -> Conv1d(3) -> Tanh.
    xpad: (Rin, Lpad) replication-padded, w1: (M1, k*Rin), w2: (Rout, 3*M1)."""
    l1 = xpad.shape[1] - (k - 1)
    xcol = jnp.concatenate([xpad[:, j:j + l1] for j in range(k)], axis=0)
    h = jnp.dot(w1, xcol, preferred_element_type=jnp.float32) + b1
    h = jnp.where(h > 0, h, LEAKY_SLOPE * h)           # LeakyReLU(0.01)
    # TODO(synk): nn.Dropout inside the SCINet blocks is identity (inference).
    hcol = jnp.concatenate([h[:, j:j + l_out] for j in range(3)], axis=0)
    y = jnp.dot(w2, hcol, preferred_element_type=jnp.float32) + b2
    return jnp.tanh(y)


# ----------------------------------------------------------------------------
# The fused kernel
# ----------------------------------------------------------------------------

def _make_kernel(*, B, D, T, O, num_levels, k, layout):
    pad_l, pad_r = _pads(k)
    BD = B * D
    lc = T >> num_levels
    nq = 1 << num_levels

    def kernel(x_ref, slab_ref, o_ref):
        def ld(name):
            off, r, c = layout[name]
            return slab_ref[off:off + r, :c]

        bn1 = ld("bn1")                                          # (BD, 2)
        state = x_ref[...] * bn1[:, 0:1] + bn1[:, 1:2]           # (BD, T), rows b*D+d

        # ----- encoder tree: one stacked pass per level ----------------------
        for lvl in range(num_levels):
            L = T >> lvl
            Lh = L >> 1
            R = state.shape[0]                                   # 2**lvl * B * D
            lpad = Lh + pad_l + pad_r
            w1 = ld("w1_%d" % lvl)
            b1 = ld("b1_%d" % lvl)
            w2 = ld("w2_%d" % lvl)
            b2 = ld("b2_%d" % lvl)
            sel = ld("sel_%d" % lvl)                             # (L, 2*lpad)
            padm = ld("pad_%d" % lvl)                            # (Lh, lpad)
            m1 = w1.shape[0] // 2                                # rows per stage (A|B)
            m2 = w2.shape[0] // 2

            # even/odd split + replication pad: ONE merged matmul
            sp = jnp.dot(state, sel, preferred_element_type=jnp.float32)
            evp = sp[:, :lpad]                                   # padded x_even
            odp = sp[:, lpad:]                                   # padded x_odd
            ev = evp[:, pad_l:pad_l + Lh]                        # unpadded x_even
            od = odp[:, pad_l:pad_l + Lh]                        # unpadded x_odd

            # stage A: phi(x_even) & psi(x_odd) for every node & batch at once
            ca = _conv_stage(jnp.concatenate([evp, odp], axis=0),
                             w1[:m1], b1[:m1], w2[:m2], b2[:m2], k, Lh)
            d_seq = od * jnp.exp(ca[:R])                         # x_odd  * exp(phi(x_even))
            c_seq = ev * jnp.exp(ca[R:])                         # x_even * exp(psi(x_odd))

            # stage B: U(d) & P(c)
            xb = jnp.dot(jnp.concatenate([d_seq, c_seq], axis=0), padm,
                         preferred_element_type=jnp.float32)
            cb_out = _conv_stage(xb, w1[m1:], b1[m1:], w2[m2:], b2[m2:], k, Lh)
            even_up = c_seq + cb_out[:R]                         # x_even_update
            odd_up = d_seq - cb_out[R:]                          # x_odd_update
            state = jnp.concatenate([even_up, odd_up], axis=0)   # (2R, Lh)

        # ----- head -----------------------------------------------------------
        # relu(2*x) commutes with the (exact) zip permutation, so the zip is
        # folded into the row-permuted time projector: nq independent dots.
        relu2 = jnp.maximum(state + state, 0.0)                  # (nq*BD, lc)
        wt_perm = ld("wt_perm")                                  # (T, O)
        tp = jnp.dot(relu2[0:BD, :], wt_perm[0:lc, :],
                     preferred_element_type=jnp.float32)
        for q in range(1, nq):
            tp = tp + jnp.dot(relu2[q * BD:(q + 1) * BD, :],
                              wt_perm[q * lc:(q + 1) * lc, :],
                              preferred_element_type=jnp.float32)

        bn2 = ld("bn2")
        y = jnp.maximum(tp * bn2[:, 0:1] + bn2[:, 1:2], 0.0)     # bn2 ; relu
        cp = jnp.dot(ld("wcb"), y, preferred_element_type=jnp.float32)   # (B, O)
        cs = jnp.dot(cp, ld("tri"), preferred_element_type=jnp.float32) + ld("bc_cum")

        # x[:, -1, -1]: direct (1,1) ref reads + select (no MXU dot)
        rows_b = lax.broadcasted_iota(jnp.int32, (B, 1), 0)
        xlast = jnp.zeros((B, 1), jnp.float32)
        for b in range(B):
            v = x_ref[b * D + D - 1:b * D + D, T - 1:T]          # (1, 1), raw x[b,-1,-1]
            xlast = jnp.where(rows_b == b, v, xlast)
        o_ref[...] = cs + xlast                                  # monotonic_fn = id

    return kernel


def _full_spec(shape):
    zeros = (0,) * len(shape)
    return pl.BlockSpec(tuple(shape), lambda i, _z=zeros: _z)


def scinet_forward(x, slab, *, num_levels, kernel_size, output_len, hidden_size):
    B, T, D = x.shape
    # TODO(synk): zip_up_the_pants odd-length tail branch not implemented;
    # requires input_len % 2**num_levels == 0 (true for the reference config).
    assert T % (1 << num_levels) == 0, "input_len must be divisible by 2**num_levels"
    O = output_len
    layout, rows, width = _slab_layout(B=B, D=D, T=T, O=O, num_levels=num_levels,
                                       k=kernel_size, hidden_size=hidden_size)
    assert slab.shape == (rows, width), (slab.shape, (rows, width))

    # TODO(synk): the only remaining wrapper op; see header for why it stays.
    x2 = jnp.transpose(x, (0, 2, 1)).reshape(B * D, T)

    kernel = _make_kernel(B=B, D=D, T=T, O=O, num_levels=num_levels,
                          k=kernel_size, layout=layout)
    return pl.pallas_call(
        kernel,
        out_shape=jax.ShapeDtypeStruct((B, O), jnp.float32),
        grid=(1,),
        in_specs=[_full_spec((B * D, T)), _full_spec((rows, width))],
        out_specs=_full_spec((B, O)),
        compiler_params=pltpu.CompilerParams(dimension_semantics=("arbitrary",)),
    )(x2, slab)


# ----------------------------------------------------------------------------
# Weight-load-time packing (done once, not per forward)
# ----------------------------------------------------------------------------

def _block_diag(blocks):
    """(n, a, b) -> block-diagonal (n*a, n*b)."""
    n, a, b = blocks.shape
    eye = jnp.eye(n, dtype=blocks.dtype)
    return jnp.einsum("nab,nm->namb", blocks, eye).reshape(n * a, n * b)


def _pack_stage(insts, k):
    """Stack a list of conv modules (w1 (k,Ch,Cin), b1, w2 (3,Cout,Ch), b2)
    into block-diagonal, im2col-flattened weights."""
    w1s = jnp.stack([m[0] for m in insts], axis=0)          # (n, k, Ch, Cin)
    w2s = jnp.stack([m[2] for m in insts], axis=0)          # (n, 3, Cout, Ch)
    w1_flat = jnp.concatenate([_block_diag(w1s[:, j]) for j in range(k)], axis=1)
    w2_flat = jnp.concatenate([_block_diag(w2s[:, j]) for j in range(3)], axis=1)
    b1 = jnp.concatenate([m[1] for m in insts], axis=0)
    b2 = jnp.concatenate([m[3] for m in insts], axis=0)
    return w1_flat, b1, w2_flat, b2


def pack_params(params, *, B, T, output_len, num_levels, kernel_size, hidden_size):
    """Fold BN stats, stack conv weights block-diagonally, permute the time
    projector, build all constant 0/1 matrices, and place everything in ONE
    lane-padded f32 slab."""
    D = params["bn1_gamma"].shape[0]
    O = output_len
    pad_l, pad_r = _pads(kernel_size)
    layout, rows, width = _slab_layout(B=B, D=D, T=T, O=O, num_levels=num_levels,
                                       k=kernel_size, hidden_size=hidden_size)
    pieces = {}

    s1 = params["bn1_gamma"] / jnp.sqrt(params["bn1_var"] + BN_EPS)
    sh1 = params["bn1_beta"] - params["bn1_mean"] * s1
    pieces["bn1"] = jnp.stack([jnp.tile(s1, B), jnp.tile(sh1, B)], axis=1)
    s2 = params["bn2_gamma"] / jnp.sqrt(params["bn2_var"] + BN_EPS)
    sh2 = params["bn2_beta"] - params["bn2_mean"] * s2
    pieces["bn2"] = jnp.stack([jnp.tile(s2, B), jnp.tile(sh2, B)], axis=1)

    groups = [params["tree"]]
    for lvl in range(num_levels):
        # instance order must match the stacked row layout inside the kernel:
        # [even-half rows -> phi per (node, batch)] then [odd-half -> psi ...]
        inst_a = ([g["block"]["phi"] for g in groups for _ in range(B)]
                  + [g["block"]["psi"] for g in groups for _ in range(B)])
        inst_b = ([g["block"]["U"] for g in groups for _ in range(B)]
                  + [g["block"]["P"] for g in groups for _ in range(B)])
        w1a, b1a, w2a, b2a = _pack_stage(inst_a, kernel_size)
        w1b, b1b, w2b, b2b = _pack_stage(inst_b, kernel_size)
        pieces["w1_%d" % lvl] = jnp.concatenate([w1a, w1b], axis=0)
        pieces["b1_%d" % lvl] = jnp.concatenate([b1a, b1b], axis=0)
        pieces["w2_%d" % lvl] = jnp.concatenate([w2a, w2b], axis=0)
        pieces["b2_%d" % lvl] = jnp.concatenate([b2a, b2b], axis=0)
        L = T >> lvl
        Lh = L >> 1
        pieces["sel_%d" % lvl] = jnp.concatenate(
            [_sel_pad_const(L, Lh, pad_l, pad_r, 0),
             _sel_pad_const(L, Lh, pad_l, pad_r, 1)], axis=1)
        pieces["pad_%d" % lvl] = _pad_const(Lh, pad_l, pad_r)
        if lvl + 1 < num_levels:
            groups = [g["even"] for g in groups] + [g["odd"] for g in groups]

    # head: row-permuted time projector (folds the "zip the pants" permutation)
    lc = T >> num_levels
    wt_t = jnp.transpose(params["wt"], (1, 0))                          # (T, O)
    r = jnp.arange(T)
    idx = (r % lc) * (1 << num_levels) + (r // lc)
    pieces["wt_perm"] = wt_t[idx]
    pieces["wcb"] = jnp.kron(jnp.eye(B, dtype=jnp.float32), params["wc"])
    pieces["bc_cum"] = (params["bc"][0]
                        * (jnp.arange(O, dtype=jnp.float32) + 1.0)).reshape(1, O)
    ro = jnp.arange(O)
    pieces["tri"] = (ro[:, None] <= ro[None, :]).astype(jnp.float32)

    slab = jnp.zeros((rows, width), jnp.float32)
    for name, arr in pieces.items():
        off, rr, cc = layout[name]
        assert arr.shape == (rr, cc), (name, arr.shape, (rr, cc))
        slab = slab.at[off:off + rr, :cc].set(arr.astype(jnp.float32))
    return slab


# ----------------------------------------------------------------------------
# Pure-JAX reference (mirrors the PyTorch module op-by-op) -- correctness oracle
# ----------------------------------------------------------------------------

_HI = lax.Precision.HIGHEST


def _ref_conv_module(x_cl, prm, k):
    w1, b1, w2, b2 = prm
    pad_l, pad_r = _pads(k)
    xp = jnp.pad(x_cl, ((0, 0), (0, 0), (pad_l, pad_r)), mode="edge")
    l1 = xp.shape[-1] - (k - 1)
    h = sum(jnp.einsum("oc,bcl->bol", w1[j], xp[:, :, j:j + l1], precision=_HI)
            for j in range(k)) + b1[None]
    h = jnp.where(h > 0, h, LEAKY_SLOPE * h)
    l2 = l1 - 2
    y = sum(jnp.einsum("oc,bcl->bol", w2[j], h[:, :, j:j + l2], precision=_HI)
            for j in range(3)) + b2[None]
    return jnp.tanh(y)


def _ref_interactor(x_btd, node, k):
    x_even = x_btd[:, ::2, :]
    x_odd = x_btd[:, 1::2, :]
    xe = jnp.transpose(x_even, (0, 2, 1))
    xo = jnp.transpose(x_odd, (0, 2, 1))
    dd = xo * jnp.exp(_ref_conv_module(xe, node["phi"], k))
    cc = xe * jnp.exp(_ref_conv_module(xo, node["psi"], k))
    even_up = cc + _ref_conv_module(dd, node["U"], k)
    odd_up = dd - _ref_conv_module(cc, node["P"], k)
    return jnp.transpose(even_up, (0, 2, 1)), jnp.transpose(odd_up, (0, 2, 1))


def _ref_zip(even, odd):
    b, le, d = even.shape
    lo = odd.shape[1]
    m = min(le, lo)
    z = jnp.stack([even[:, :m], odd[:, :m]], axis=2).reshape(b, 2 * m, d)
    if lo < le:
        z = jnp.concatenate([z, even[:, -1:]], axis=1)
    return z


def _ref_tree(x, level, prm, k):
    e, o = _ref_interactor(x, prm["block"], k)
    if level == 0:
        return _ref_zip(e, o)
    return _ref_zip(_ref_tree(e, level - 1, prm["even"], k),
                    _ref_tree(o, level - 1, prm["odd"], k))


def ref_forward(x, params, *, num_levels, kernel_size):
    s1 = params["bn1_gamma"] / jnp.sqrt(params["bn1_var"] + BN_EPS)
    b1 = params["bn1_beta"] - params["bn1_mean"] * s1
    out = x * s1[None, None, :] + b1[None, None, :]
    out = _ref_tree(out, num_levels - 1, params["tree"], kernel_size)
    out = jnp.maximum(out + out, 0.0)
    t1 = jnp.einsum("ot,btd->bod", params["wt"], out, precision=_HI)
    t1 = jnp.transpose(t1, (0, 2, 1))
    s2 = params["bn2_gamma"] / jnp.sqrt(params["bn2_var"] + BN_EPS)
    b2 = params["bn2_beta"] - params["bn2_mean"] * s2
    y = jnp.maximum(t1 * s2[None, :, None] + b2[None, :, None], 0.0)
    cp = jnp.einsum("d,bdo->bo", params["wc"][0], y, precision=_HI) + params["bc"][0]
    return jnp.cumsum(cp, axis=-1) + x[:, -1, -1][:, None]


# ----------------------------------------------------------------------------
# Deterministic synthetic parameters
# ----------------------------------------------------------------------------

def init_conv_block(key, in_planes, hidden_size, kernel_size):
    ch = int(in_planes * hidden_size)
    k1, k2, k3, k4 = jax.random.split(key, 4)
    w1 = jax.random.normal(k1, (kernel_size, ch, in_planes), jnp.float32) * 0.2
    b1 = jax.random.normal(k2, (ch, 1), jnp.float32) * 0.1
    w2 = jax.random.normal(k3, (3, in_planes, ch), jnp.float32) * 0.2
    b2 = jax.random.normal(k4, (in_planes, 1), jnp.float32) * 0.1
    return (w1, b1, w2, b2)


def init_tree_params(key, level, in_planes, hidden_size, kernel_size):
    keys = jax.random.split(key, 6)
    node = {
        "block": {
            "phi": init_conv_block(keys[0], in_planes, hidden_size, kernel_size),
            "psi": init_conv_block(keys[1], in_planes, hidden_size, kernel_size),
            "P": init_conv_block(keys[2], in_planes, hidden_size, kernel_size),
            "U": init_conv_block(keys[3], in_planes, hidden_size, kernel_size),
        }
    }
    if level > 0:
        node["even"] = init_tree_params(keys[4], level - 1, in_planes,
                                        hidden_size, kernel_size)
        node["odd"] = init_tree_params(keys[5], level - 1, in_planes,
                                       hidden_size, kernel_size)
    return node


if __name__ == "__main__":
    # SimpleSCINet(input_len=16, output_len=8, input_dim=4, num_levels=2,
    #              kernel_size=5, dropout=0.5, groups=1, hidden_size=2)
    B, T, D = 2, 16, 4
    O = 8
    num_levels = 2
    kernel_size = 5
    hidden_size = 2

    key = jax.random.PRNGKey(0)
    kx, kp = jax.random.split(key)
    ks = jax.random.split(kp, 12)

    x = jax.random.normal(kx, (B, T, D), jnp.float32)

    params = {
        "bn1_gamma": 1.0 + 0.1 * jax.random.normal(ks[0], (D,), jnp.float32),
        "bn1_beta": 0.1 * jax.random.normal(ks[1], (D,), jnp.float32),
        "bn1_mean": 0.1 * jax.random.normal(ks[2], (D,), jnp.float32),
        "bn1_var": 1.0 + 0.1 * jnp.abs(jax.random.normal(ks[3], (D,), jnp.float32)),
        "bn2_gamma": 1.0 + 0.1 * jax.random.normal(ks[4], (D,), jnp.float32),
        "bn2_beta": 0.1 * jax.random.normal(ks[5], (D,), jnp.float32),
        "bn2_mean": 0.1 * jax.random.normal(ks[6], (D,), jnp.float32),
        "bn2_var": 1.0 + 0.1 * jnp.abs(jax.random.normal(ks[7], (D,), jnp.float32)),
        "tree": init_tree_params(ks[8], num_levels - 1, D, hidden_size, kernel_size),
        "wt": jax.random.normal(ks[9], (O, T), jnp.float32) * 0.2,   # Conv1d(T->O, k=1), no bias
        "wc": jax.random.normal(ks[10], (1, D), jnp.float32) * 0.2,  # Conv1d(D->1, k=1)
        "bc": jax.random.normal(ks[11], (1,), jnp.float32) * 0.1,
    }

    # Weight-load-time packing: ONE f32 slab with folded BN, block-diag im2col
    # conv stacks, merged select/pad constants, permuted time projector, ...
    slab = pack_params(params, B=B, T=T, output_len=O, num_levels=num_levels,
                       kernel_size=kernel_size, hidden_size=hidden_size)

    fwd = jax.jit(functools.partial(scinet_forward, num_levels=num_levels,
                                    kernel_size=kernel_size, output_len=O,
                                    hidden_size=hidden_size))
    out = jax.block_until_ready(fwd(x, slab))

    assert out.shape == (B, O) and out.dtype == jnp.float32
    assert bool(jnp.all(jnp.isfinite(out)))

    # Cross-check the fused kernel against a plain-JAX op-by-op reference.
    ref = ref_forward(x, params, num_levels=num_levels, kernel_size=kernel_size)
    scale = max(float(jnp.max(jnp.abs(ref))), 1.0)
    err = float(jnp.max(jnp.abs(out - ref)))
    assert err <= 2e-2 * scale, f"kernel/reference mismatch: {err} (scale {scale})"

    print("KERNEL_OK")
</pallas_src>

<mosaic_0001>
module attributes {stable_mosaic.version = 11 : i64} {
  func.func @kernel(%arg0: i32, %arg1: memref<8x16xf32, #tpu.memory_space<vmem>>, %arg2: memref<672x256xf32, #tpu.memory_space<vmem>>, %arg3: memref<2x8xf32, #tpu.memory_space<vmem>>) attributes {dimension_semantics = [#tpu.dimension_semantics<arbitrary>], iteration_bounds = array<i64: 1>, scalar_prefetch = 0 : i64, scratch_operands = 0 : i64, tpu.core_type = #tpu.core_type<tc>, window_params = [{pipeline_mode = #tpu.pipeline_mode<synchronous>, transform_indices = @transform_0, window_bounds = array<i64: 8, 16>}, {pipeline_mode = #tpu.pipeline_mode<synchronous>, transform_indices = @transform_1, window_bounds = array<i64: 672, 256>}, {pipeline_mode = #tpu.pipeline_mode<synchronous>, transform_indices = @transform_2, window_bounds = array<i64: 2, 8>}]} {
    %c0 = arith.constant 0 : index
    %c0_0 = arith.constant 0 : index
    %0 = vector.load %arg2[%c0, %c0_0] : memref<672x256xf32, #tpu.memory_space<vmem>>, vector<8x2xf32>
    %c0_1 = arith.constant 0 : index
    %c0_2 = arith.constant 0 : index
    %1 = vector.load %arg1[%c0_1, %c0_2] : memref<8x16xf32, #tpu.memory_space<vmem>>, vector<8x16xf32>
    %2 = vector.extract_strided_slice %0 {offsets = [0, 0], sizes = [8, 1], strides = [1, 1]} : vector<8x2xf32> to vector<8x1xf32>
    %3 = vector.broadcast %2 : vector<8x1xf32> to vector<8x16xf32>
    %4 = arith.mulf %1, %3 : vector<8x16xf32>
    %5 = vector.extract_strided_slice %0 {offsets = [0, 1], sizes = [8, 1], strides = [1, 1]} : vector<8x2xf32> to vector<8x1xf32>
    %6 = vector.broadcast %5 : vector<8x1xf32> to vector<8x16xf32>
    %7 = arith.addf %4, %6 : vector<8x16xf32>
    %c8 = arith.constant 8 : index
    %c0_3 = arith.constant 0 : index
    %8 = vector.load %arg2[%c8, %c0_3] : memref<672x256xf32, #tpu.memory_space<vmem>>, vector<64x80xf32>
    %c72 = arith.constant 72 : index
    %c0_4 = arith.constant 0 : index
    %9 = vector.load %arg2[%c72, %c0_4] : memref<672x256xf32, #tpu.memory_space<vmem>>, vector<64x1xf32>
    %c136 = arith.constant 136 : index
    %c0_5 = arith.constant 0 : index
    %10 = vector.load %arg2[%c136, %c0_5] : memref<672x256xf32, #tpu.memory_space<vmem>>, vector<32x96xf32>
    %c168 = arith.constant 168 : index
    %c0_6 = arith.constant 0 : index
    %11 = vector.load %arg2[%c168, %c0_6] : memref<672x256xf32, #tpu.memory_space<vmem>>, vector<32x1xf32>
    %c200 = arith.constant 200 : index
    %c0_7 = arith.constant 0 : index
    %12 = vector.load %arg2[%c200, %c0_7] : memref<672x256xf32, #tpu.memory_space<vmem>>, vector<16x28xf32>
    %c216 = arith.constant 216 : index
    %c0_8 = arith.constant 0 : index
    %13 = vector.load %arg2[%c216, %c0_8] : memref<672x256xf32, #tpu.memory_space<vmem>>, vector<8x14xf32>
    %cst = arith.constant dense<0.000000e+00> : vector<8x28xf32>
    %14 = tpu.matmul %7, %12, %cst {dimension_numbers = #tpu.dot_dimension_numbers<[1], [0], [0], [1], [0, 0, 1, 1], [], []>} : vector<8x16xf32>, vector<16x28xf32>, vector<8x28xf32> -> vector<8x28xf32>
    %15 = vector.extract_strided_slice %14 {offsets = [0, 0], sizes = [8, 14], strides = [1, 1]} : vector<8x28xf32> to vector<8x14xf32>
    %16 = vector.extract_strided_slice %14 {offsets = [0, 14], sizes = [8, 14], strides = [1, 1]} : vector<8x28xf32> to vector<8x14xf32>
    %17 = vector.extract_strided_slice %15 {offsets = [0, 3], sizes = [8, 8], strides = [1, 1]} : vector<8x14xf32> to vector<8x8xf32>
    %18 = vector.extract_strided_slice %16 {offsets = [0, 3], sizes = [8, 8], strides = [1, 1]} : vector<8x14xf32> to vector<8x8xf32>
    %19 = tpu.concatenate %15, %16 in 0 : vector<8x14xf32>, vector<8x14xf32> -> vector<16x14xf32>
    %20 = vector.extract_strided_slice %8 {offsets = [0, 0], sizes = [32, 80], strides = [1, 1]} : vector<64x80xf32> to vector<32x80xf32>
    %21 = vector.extract_strided_slice %9 {offsets = [0, 0], sizes = [32, 1], strides = [1, 1]} : vector<64x1xf32> to vector<32x1xf32>
    %22 = vector.extract_strided_slice %10 {offsets = [0, 0], sizes = [16, 96], strides = [1, 1]} : vector<32x96xf32> to vector<16x96xf32>
    %23 = vector.extract_strided_slice %11 {offsets = [0, 0], sizes = [16, 1], strides = [1, 1]} : vector<32x1xf32> to vector<16x1xf32>
    %24 = vector.extract_strided_slice %19 {offsets = [0, 0], sizes = [16, 10], strides = [1, 1]} : vector<16x14xf32> to vector<16x10xf32>
    %25 = vector.extract_strided_slice %19 {offsets = [0, 1], sizes = [16, 10], strides = [1, 1]} : vector<16x14xf32> to vector<16x10xf32>
    %26 = vector.extract_strided_slice %19 {offsets = [0, 2], sizes = [16, 10], strides = [1, 1]} : vector<16x14xf32> to vector<16x10xf32>
    %27 = vector.extract_strided_slice %19 {offsets = [0, 3], sizes = [16, 10], strides = [1, 1]} : vector<16x14xf32> to vector<16x10xf32>
    %28 = vector.extract_strided_slice %19 {offsets = [0, 4], sizes = [16, 10], strides = [1, 1]} : vector<16x14xf32> to vector<16x10xf32>
    %29 = tpu.concatenate %24, %25, %26, %27, %28 in 0 : vector<16x10xf32>, vector<16x10xf32>, vector<16x10xf32>, vector<16x10xf32>, vector<16x10xf32> -> vector<80x10xf32>
    %cst_9 = arith.constant dense<0.000000e+00> : vector<32x10xf32>
    %30 = tpu.matmul %20, %29, %cst_9 {dimension_numbers = #tpu.dot_dimension_numbers<[1], [0], [0], [1], [0, 0, 1, 1], [], []>} : vector<32x80xf32>, vector<80x10xf32>, vector<32x10xf32> -> vector<32x10xf32>
    %31 = vector.broadcast %21 : vector<32x1xf32> to vector<32x10xf32>
    %32 = arith.addf %30, %31 : vector<32x10xf32>
    %cst_10 = arith.constant 0.000000e+00 : f32
    %33 = vector.broadcast %cst_10 : f32 to vector<32x10xf32>
    %34 = arith.cmpf ogt, %32, %33 : vector<32x10xf32>
    %cst_11 = arith.constant 0.00999999977 : f32
    %35 = vector.broadcast %cst_11 : f32 to vector<32x10xf32>
    %36 = arith.mulf %35, %32 : vector<32x10xf32>
    %37 = arith.select %34, %32, %36 : vector<32x10xi1>, vector<32x10xf32>
    %38 = vector.extract_strided_slice %37 {offsets = [0, 0], sizes = [32, 8], strides = [1, 1]} : vector<32x10xf32> to vector<32x8xf32>
    %39 = vector.extract_strided_slice %37 {offsets = [0, 1], sizes = [32, 8], strides = [1, 1]} : vector<32x10xf32> to vector<32x8xf32>
    %40 = vector.extract_strided_slice %37 {offsets = [0, 2], sizes = [32, 8], strides = [1, 1]} : vector<32x10xf32> to vector<32x8xf32>
    %41 = tpu.concatenate %38, %39, %40 in 0 : vector<32x8xf32>, vector<32x8xf32>, vector<32x8xf32> -> vector<96x8xf32>
    %cst_12 = arith.constant dense<0.000000e+00> : vector<16x8xf32>
    %42 = tpu.matmul %22, %41, %cst_12 {dimension_numbers = #tpu.dot_dimension_numbers<[1], [0], [0], [1], [0, 0, 1, 1], [], []>} : vector<16x96xf32>, vector<96x8xf32>, vector<16x8xf32> -> vector<16x8xf32>
    %43 = vector.broadcast %23 : vector<16x1xf32> to vector<16x8xf32>
    %44 = arith.addf %42, %43 : vector<16x8xf32>
    %45 = math.tanh %44 : vector<16x8xf32>
    %46 = vector.extract_strided_slice %45 {offsets = [0, 0], sizes = [8, 8], strides = [1, 1]} : vector<16x8xf32> to vector<8x8xf32>
    %47 = math.exp %46 : vector<8x8xf32>
    %48 = arith.mulf %18, %47 : vector<8x8xf32>
    %49 = vector.extract_strided_slice %45 {offsets = [8, 0], sizes = [8, 8], strides = [1, 1]} : vector<16x8xf32> to vector<8x8xf32>
    %50 = math.exp %49 : vector<8x8xf32>
    %51 = arith.mulf %17, %50 : vector<8x8xf32>
    %52 = tpu.concatenate %48, %51 in 0 : vector<8x8xf32>, vector<8x8xf32> -> vector<16x8xf32>
    %cst_13 = arith.constant dense<0.000000e+00> : vector<16x14xf32>
    %53 = tpu.matmul %52, %13, %cst_13 {dimension_numbers = #tpu.dot_dimension_numbers<[1], [0], [0], [1], [0, 0, 1, 1], [], []>} : vector<16x8xf32>, vector<8x14xf32>, vector<16x14xf32> -> vector<16x14xf32>
    %54 = vector.extract_strided_slice %8 {offsets = [32, 0], sizes = [32, 80], strides = [1, 1]} : vector<64x80xf32> to vector<32x80xf32>
    %55 = vector.extract_strided_slice %9 {offsets = [32, 0], sizes = [32, 1], strides = [1, 1]} : vector<64x1xf32> to vector<32x1xf32>
    %56 = vector.extract_strided_slice %10 {offsets = [16, 0], sizes = [16, 96], strides = [1, 1]} : vector<32x96xf32> to vector<16x96xf32>
    %57 = vector.extract_strided_slice %11 {offsets = [16, 0], sizes = [16, 1], strides = [1, 1]} : vector<32x1xf32> to vector<16x1xf32>
    %58 = vector.extract_strided_slice %53 {offsets = [0, 0], sizes = [16, 10], strides = [1, 1]} : vector<16x14xf32> to vector<16x10xf32>
    %59 = vector.extract_strided_slice %53 {offsets = [0, 1], sizes = [16, 10], strides = [1, 1]} : vector<16x14xf32> to vector<16x10xf32>
    %60 = vector.extract_strided_slice %53 {offsets = [0, 2], sizes = [16, 10], strides = [1, 1]} : vector<16x14xf32> to vector<16x10xf32>
    %61 = vector.extract_strided_slice %53 {offsets = [0, 3], sizes = [16, 10], strides = [1, 1]} : vector<16x14xf32> to vector<16x10xf32>
    %62 = vector.extract_strided_slice %53 {offsets = [0, 4], sizes = [16, 10], strides = [1, 1]} : vector<16x14xf32> to vector<16x10xf32>
    %63 = tpu.concatenate %58, %59, %60, %61, %62 in 0 : vector<16x10xf32>, vector<16x10xf32>, vector<16x10xf32>, vector<16x10xf32>, vector<16x10xf32> -> vector<80x10xf32>
    %cst_14 = arith.constant dense<0.000000e+00> : vector<32x10xf32>
    %64 = tpu.matmul %54, %63, %cst_14 {dimension_numbers = #tpu.dot_dimension_numbers<[1], [0], [0], [1], [0, 0, 1, 1], [], []>} : vector<32x80xf32>, vector<80x10xf32>, vector<32x10xf32> -> vector<32x10xf32>
    %65 = vector.broadcast %55 : vector<32x1xf32> to vector<32x10xf32>
    %66 = arith.addf %64, %65 : vector<32x10xf32>
    %cst_15 = arith.constant 0.000000e+00 : f32
    %67 = vector.broadcast %cst_15 : f32 to vector<32x10xf32>
    %68 = arith.cmpf ogt, %66, %67 : vector<32x10xf32>
    %cst_16 = arith.constant 0.00999999977 : f32
    %69 = vector.broadcast %cst_16 : f32 to vector<32x10xf32>
    %70 = arith.mulf %69, %66 : vector<32x10xf32>
    %71 = arith.select %68, %66, %70 : vector<32x10xi1>, vector<32x10xf32>
    %72 = vector.extract_strided_slice %71 {offsets = [0, 0], sizes = [32, 8], strides = [1, 1]} : vector<32x10xf32> to vector<32x8xf32>
    %73 = vector.extract_strided_slice %71 {offsets = [0, 1], sizes = [32, 8], strides = [1, 1]} : vector<32x10xf32> to vector<32x8xf32>
    %74 = vector.extract_strided_slice %71 {offsets = [0, 2], sizes = [32, 8], strides = [1, 1]} : vector<32x10xf32> to vector<32x8xf32>
    %75 = tpu.concatenate %72, %73, %74 in 0 : vector<32x8xf32>, vector<32x8xf32>, vector<32x8xf32> -> vector<96x8xf32>
    %cst_17 = arith.constant dense<0.000000e+00> : vector<16x8xf32>
    %76 = tpu.matmul %56, %75, %cst_17 {dimension_numbers = #tpu.dot_dimension_numbers<[1], [0], [0], [1], [0, 0, 1, 1], [], []>} : vector<16x96xf32>, vector<96x8xf32>, vector<16x8xf32> -> vector<16x8xf32>
    %77 = vector.broadcast %57 : vector<16x1xf32> to vector<16x8xf32>
    %78 = arith.addf %76, %77 : vector<16x8xf32>
    %79 = math.tanh %78 : vector<16x8xf32>
    %80 = vector.extract_strided_slice %79 {offsets = [0, 0], sizes = [8, 8], strides = [1, 1]} : vector<16x8xf32> to vector<8x8xf32>
    %81 = arith.addf %51, %80 : vector<8x8xf32>
    %82 = vector.extract_strided_slice %79 {offsets = [8, 0], sizes = [8, 8], strides = [1, 1]} : vector<16x8xf32> to vector<8x8xf32>
    %83 = arith.subf %48, %82 : vector<8x8xf32>
    %84 = tpu.concatenate %81, %83 in 0 : vector<8x8xf32>, vector<8x8xf32> -> vector<16x8xf32>
    %c224 = arith.constant 224 : index
    %c0_18 = arith.constant 0 : index
    %85 = vector.load %arg2[%c224, %c0_18] : memref<672x256xf32, #tpu.memory_space<vmem>>, vector<128x160xf32>
    %c352 = arith.constant 352 : index
    %c0_19 = arith.constant 0 : index
    %86 = vector.load %arg2[%c352, %c0_19] : memref<672x256xf32, #tpu.memory_space<vmem>>, vector<128x1xf32>
    %c480 = arith.constant 480 : index
    %c0_20 = arith.constant 0 : index
    %87 = vector.load %arg2[%c480, %c0_20] : memref<672x256xf32, #tpu.memory_space<vmem>>, vector<64x192xf32>
    %c544 = arith.constant 544 : index
    %c0_21 = arith.constant 0 : index
    %88 = vector.load %arg2[%c544, %c0_21] : memref<672x256xf32, #tpu.memory_space<vmem>>, vector<64x1xf32>
    %c608 = arith.constant 608 : index
    %c0_22 = arith.constant 0 : index
    %89 = vector.load %arg2[%c608, %c0_22] : memref<672x256xf32, #tpu.memory_space<vmem>>, vector<8x20xf32>
    %c616 = arith.constant 616 : index
    %c0_23 = arith.constant 0 : index
    %90 = vector.load %arg2[%c616, %c0_23] : memref<672x256xf32, #tpu.memory_space<vmem>>, vector<4x10xf32>
    %cst_24 = arith.constant dense<0.000000e+00> : vector<16x20xf32>
    %91 = tpu.matmul %84, %89, %cst_24 {dimension_numbers = #tpu.dot_dimension_numbers<[1], [0], [0], [1], [0, 0, 1, 1], [], []>} : vector<16x8xf32>, vector<8x20xf32>, vector<16x20xf32> -> vector<16x20xf32>
    %92 = vector.extract_strided_slice %91 {offsets = [0, 0], sizes = [16, 10], strides = [1, 1]} : vector<16x20xf32> to vector<16x10xf32>
    %93 = vector.extract_strided_slice %91 {offsets = [0, 10], sizes = [16, 10], strides = [1, 1]} : vector<16x20xf32> to vector<16x10xf32>
    %94 = vector.extract_strided_slice %92 {offsets = [0, 3], sizes = [16, 4], strides = [1, 1]} : vector<16x10xf32> to vector<16x4xf32>
    %95 = vector.extract_strided_slice %93 {offsets = [0, 3], sizes = [16, 4], strides = [1, 1]} : vector<16x10xf32> to vector<16x4xf32>
    %96 = tpu.concatenate %92, %93 in 0 : vector<16x10xf32>, vector<16x10xf32> -> vector<32x10xf32>
    %97 = vector.extract_strided_slice %85 {offsets = [0, 0], sizes = [64, 160], strides = [1, 1]} : vector<128x160xf32> to vector<64x160xf32>
    %98 = vector.extract_strided_slice %86 {offsets = [0, 0], sizes = [64, 1], strides = [1, 1]} : vector<128x1xf32> to vector<64x1xf32>
    %99 = vector.extract_strided_slice %87 {offsets = [0, 0], sizes = [32, 192], strides = [1, 1]} : vector<64x192xf32> to vector<32x192xf32>
    %100 = vector.extract_strided_slice %88 {offsets = [0, 0], sizes = [32, 1], strides = [1, 1]} : vector<64x1xf32> to vector<32x1xf32>
    %101 = vector.extract_strided_slice %96 {offsets = [0, 0], sizes = [32, 6], strides = [1, 1]} : vector<32x10xf32> to vector<32x6xf32>
    %102 = vector.extract_strided_slice %96 {offsets = [0, 1], sizes = [32, 6], strides = [1, 1]} : vector<32x10xf32> to vector<32x6xf32>
    %103 = vector.extract_strided_slice %96 {offsets = [0, 2], sizes = [32, 6], strides = [1, 1]} : vector<32x10xf32> to vector<32x6xf32>
    %104 = vector.extract_strided_slice %96 {offsets = [0, 3], sizes = [32, 6], strides = [1, 1]} : vector<32x10xf32> to vector<32x6xf32>
    %105 = vector.extract_strided_slice %96 {offsets = [0, 4], sizes = [32, 6], strides = [1, 1]} : vector<32x10xf32> to vector<32x6xf32>
    %106 = tpu.concatenate %101, %102, %103, %104, %105 in 0 : vector<32x6xf32>, vector<32x6xf32>, vector<32x6xf32>, vector<32x6xf32>, vector<32x6xf32> -> vector<160x6xf32>
    %cst_25 = arith.constant dense<0.000000e+00> : vector<64x6xf32>
    %107 = tpu.matmul %97, %106, %cst_25 {dimension_numbers = #tpu.dot_dimension_numbers<[1], [0], [0], [1], [0, 0, 1, 1], [], []>} : vector<64x160xf32>, vector<160x6xf32>, vector<64x6xf32> -> vector<64x6xf32>
    %108 = vector.broadcast %98 : vector<64x1xf32> to vector<64x6xf32>
    %109 = arith.addf %107, %108 : vector<64x6xf32>
    %cst_26 = arith.constant 0.000000e+00 : f32
    %110 = vector.broadcast %cst_26 : f32 to vector<64x6xf32>
    %111 = arith.cmpf ogt, %109, %110 : vector<64x6xf32>
    %cst_27 = arith.constant 0.00999999977 : f32
    %112 = vector.broadcast %cst_27 : f32 to vector<64x6xf32>
    %113 = arith.mulf %112, %109 : vector<64x6xf32>
    %114 = arith.select %111, %109, %113 : vector<64x6xi1>, vector<64x6xf32>
    %115 = vector.extract_strided_slice %114 {offsets = [0, 0], sizes = [64, 4], strides = [1, 1]} : vector<64x6xf32> to vector<64x4xf32>
    %116 = vector.extract_strided_slice %114 {offsets = [0, 1], sizes = [64, 4], strides = [1, 1]} : vector<64x6xf32> to vector<64x4xf32>
    %117 = vector.extract_strided_slice %114 {offsets = [0, 2], sizes = [64, 4], strides = [1, 1]} : vector<64x6xf32> to vector<64x4xf32>
    %118 = tpu.concatenate %115, %116, %117 in 0 : vector<64x4xf32>, vector<64x4xf32>, vector<64x4xf32> -> vector<192x4xf32>
    %cst_28 = arith.constant dense<0.000000e+00> : vector<32x4xf32>
    %119 = tpu.matmul %99, %118, %cst_28 {dimension_numbers = #tpu.dot_dimension_numbers<[1], [0], [0], [1], [0, 0, 1, 1], [], []>} : vector<32x192xf32>, vector<192x4xf32>, vector<32x4xf32> -> vector<32x4xf32>
    %120 = vector.broadcast %100 : vector<32x1xf32> to vector<32x4xf32>
    %121 = arith.addf %119, %120 : vector<32x4xf32>
    %122 = math.tanh %121 : vector<32x4xf32>
    %123 = vector.extract_strided_slice %122 {offsets = [0, 0], sizes = [16, 4], strides = [1, 1]} : vector<32x4xf32> to vector<16x4xf32>
    %124 = math.exp %123 : vector<16x4xf32>
    %125 = arith.mulf %95, %124 : vector<16x4xf32>
    %126 = vector.extract_strided_slice %122 {offsets = [16, 0], sizes = [16, 4], strides = [1, 1]} : vector<32x4xf32> to vector<16x4xf32>
    %127 = math.exp %126 : vector<16x4xf32>
    %128 = arith.mulf %94, %127 : vector<16x4xf32>
    %129 = tpu.concatenate %125, %128 in 0 : vector<16x4xf32>, vector<16x4xf32> -> vector<32x4xf32>
    %cst_29 = arith.constant dense<0.000000e+00> : vector<32x10xf32>
    %130 = tpu.matmul %129, %90, %cst_29 {dimension_numbers = #tpu.dot_dimension_numbers<[1], [0], [0], [1], [0, 0, 1, 1], [], []>} : vector<32x4xf32>, vector<4x10xf32>, vector<32x10xf32> -> vector<32x10xf32>
    %131 = vector.extract_strided_slice %85 {offsets = [64, 0], sizes = [64, 160], strides = [1, 1]} : vector<128x160xf32> to vector<64x160xf32>
    %132 = vector.extract_strided_slice %86 {offsets = [64, 0], sizes = [64, 1], strides = [1, 1]} : vector<128x1xf32> to vector<64x1xf32>
    %133 = vector.extract_strided_slice %87 {offsets = [32, 0], sizes = [32, 192], strides = [1, 1]} : vector<64x192xf32> to vector<32x192xf32>
    %134 = vector.extract_strided_slice %88 {offsets = [32, 0], sizes = [32, 1], strides = [1, 1]} : vector<64x1xf32> to vector<32x1xf32>
    %135 = vector.extract_strided_slice %130 {offsets = [0, 0], sizes = [32, 6], strides = [1, 1]} : vector<32x10xf32> to vector<32x6xf32>
    %136 = vector.extract_strided_slice %130 {offsets = [0, 1], sizes = [32, 6], strides = [1, 1]} : vector<32x10xf32> to vector<32x6xf32>
    %137 = vector.extract_strided_slice %130 {offsets = [0, 2], sizes = [32, 6], strides = [1, 1]} : vector<32x10xf32> to vector<32x6xf32>
    %138 = vector.extract_strided_slice %130 {offsets = [0, 3], sizes = [32, 6], strides = [1, 1]} : vector<32x10xf32> to vector<32x6xf32>
    %139 = vector.extract_strided_slice %130 {offsets = [0, 4], sizes = [32, 6], strides = [1, 1]} : vector<32x10xf32> to vector<32x6xf32>
    %140 = tpu.concatenate %135, %136, %137, %138, %139 in 0 : vector<32x6xf32>, vector<32x6xf32>, vector<32x6xf32>, vector<32x6xf32>, vector<32x6xf32> -> vector<160x6xf32>
    %cst_30 = arith.constant dense<0.000000e+00> : vector<64x6xf32>
    %141 = tpu.matmul %131, %140, %cst_30 {dimension_numbers = #tpu.dot_dimension_numbers<[1], [0], [0], [1], [0, 0, 1, 1], [], []>} : vector<64x160xf32>, vector<160x6xf32>, vector<64x6xf32> -> vector<64x6xf32>
    %142 = vector.broadcast %132 : vector<64x1xf32> to vector<64x6xf32>
    %143 = arith.addf %141, %142 : vector<64x6xf32>
    %cst_31 = arith.constant 0.000000e+00 : f32
    %144 = vector.broadcast %cst_31 : f32 to vector<64x6xf32>
    %145 = arith.cmpf ogt, %143, %144 : vector<64x6xf32>
    %cst_32 = arith.constant 0.00999999977 : f32
    %146 = vector.broadcast %cst_32 : f32 to vector<64x6xf32>
    %147 = arith.mulf %146, %143 : vector<64x6xf32>
    %148 = arith.select %145, %143, %147 : vector<64x6xi1>, vector<64x6xf32>
    %149 = vector.extract_strided_slice %148 {offsets = [0, 0], sizes = [64, 4], strides = [1, 1]} : vector<64x6xf32> to vector<64x4xf32>
    %150 = vector.extract_strided_slice %148 {offsets = [0, 1], sizes = [64, 4], strides = [1, 1]} : vector<64x6xf32> to vector<64x4xf32>
    %151 = vector.extract_strided_slice %148 {offsets = [0, 2], sizes = [64, 4], strides = [1, 1]} : vector<64x6xf32> to vector<64x4xf32>
    %152 = tpu.concatenate %149, %150, %151 in 0 : vector<64x4xf32>, vector<64x4xf32>, vector<64x4xf32> -> vector<192x4xf32>
    %cst_33 = arith.constant dense<0.000000e+00> : vector<32x4xf32>
    %153 = tpu.matmul %133, %152, %cst_33 {dimension_numbers = #tpu.dot_dimension_numbers<[1], [0], [0], [1], [0, 0, 1, 1], [], []>} : vector<32x192xf32>, vector<192x4xf32>, vector<32x4xf32> -> vector<32x4xf32>
    %154 = vector.broadcast %134 : vector<32x1xf32> to vector<32x4xf32>
    %155 = arith.addf %153, %154 : vector<32x4xf32>
    %156 = math.tanh %155 : vector<32x4xf32>
    %157 = vector.extract_strided_slice %156 {offsets = [0, 0], sizes = [16, 4], strides = [1, 1]} : vector<32x4xf32> to vector<16x4xf32>
    %158 = arith.addf %128, %157 : vector<16x4xf32>
    %159 = vector.extract_strided_slice %156 {offsets = [16, 0], sizes = [16, 4], strides = [1, 1]} : vector<32x4xf32> to vector<16x4xf32>
    %160 = arith.subf %125, %159 : vector<16x4xf32>
    %161 = tpu.concatenate %158, %160 in 0 : vector<16x4xf32>, vector<16x4xf32> -> vector<32x4xf32>
    %162 = arith.addf %161, %161 : vector<32x4xf32>
    %cst_34 = arith.constant 0.000000e+00 : f32
    %163 = vector.broadcast %cst_34 : f32 to vector<32x4xf32>
    %164 = arith.maximumf %162, %163 : vector<32x4xf32>
    %c632 = arith.constant 632 : index
    %c0_35 = arith.constant 0 : index
    %165 = vector.load %arg2[%c632, %c0_35] : memref<672x256xf32, #tpu.memory_space<vmem>>, vector<16x8xf32>
    %166 = vector.extract_strided_slice %164 {offsets = [0, 0], sizes = [8, 4], strides = [1, 1]} : vector<32x4xf32> to vector<8x4xf32>
    %167 = vector.extract_strided_slice %165 {offsets = [0, 0], sizes = [4, 8], strides = [1, 1]} : vector<16x8xf32> to vector<4x8xf32>
    %cst_36 = arith.constant dense<0.000000e+00> : vector<8x8xf32>
    %168 = tpu.matmul %166, %167, %cst_36 {dimension_numbers = #tpu.dot_dimension_numbers<[1], [0], [0], [1], [0, 0, 1, 1], [], []>} : vector<8x4xf32>, vector<4x8xf32>, vector<8x8xf32> -> vector<8x8xf32>
    %169 = vector.extract_strided_slice %164 {offsets = [8, 0], sizes = [8, 4], strides = [1, 1]} : vector<32x4xf32> to vector<8x4xf32>
    %170 = vector.extract_strided_slice %165 {offsets = [4, 0], sizes = [4, 8], strides = [1, 1]} : vector<16x8xf32> to vector<4x8xf32>
    %cst_37 = arith.constant dense<0.000000e+00> : vector<8x8xf32>
    %171 = tpu.matmul %169, %170, %cst_37 {dimension_numbers = #tpu.dot_dimension_numbers<[1], [0], [0], [1], [0, 0, 1, 1], [], []>} : vector<8x4xf32>, vector<4x8xf32>, vector<8x8xf32> -> vector<8x8xf32>
    %172 = arith.addf %168, %171 : vector<8x8xf32>
    %173 = vector.extract_strided_slice %164 {offsets = [16, 0], sizes = [8, 4], strides = [1, 1]} : vector<32x4xf32> to vector<8x4xf32>
    %174 = vector.extract_strided_slice %165 {offsets = [8, 0], sizes = [4, 8], strides = [1, 1]} : vector<16x8xf32> to vector<4x8xf32>
    %cst_38 = arith.constant dense<0.000000e+00> : vector<8x8xf32>
    %175 = tpu.matmul %173, %174, %cst_38 {dimension_numbers = #tpu.dot_dimension_numbers<[1], [0], [0], [1], [0, 0, 1, 1], [], []>} : vector<8x4xf32>, vector<4x8xf32>, vector<8x8xf32> -> vector<8x8xf32>
    %176 = arith.addf %172, %175 : vector<8x8xf32>
    %177 = vector.extract_strided_slice %164 {offsets = [24, 0], sizes = [8, 4], strides = [1, 1]} : vector<32x4xf32> to vector<8x4xf32>
    %178 = vector.extract_strided_slice %165 {offsets = [12, 0], sizes = [4, 8], strides = [1, 1]} : vector<16x8xf32> to vector<4x8xf32>
    %cst_39 = arith.constant dense<0.000000e+00> : vector<8x8xf32>
    %179 = tpu.matmul %177, %178, %cst_39 {dimension_numbers = #tpu.dot_dimension_numbers<[1], [0], [0], [1], [0, 0, 1, 1], [], []>} : vector<8x4xf32>, vector<4x8xf32>, vector<8x8xf32> -> vector<8x8xf32>
    %180 = arith.addf %176, %179 : vector<8x8xf32>
    %c624 = arith.constant 624 : index
    %c0_40 = arith.constant 0 : index
    %181 = vector.load %arg2[%c624, %c0_40] : memref<672x256xf32, #tpu.memory_space<vmem>>, vector<8x2xf32>
    %182 = vector.extract_strided_slice %181 {offsets = [0, 0], sizes = [8, 1], strides = [1, 1]} : vector<8x2xf32> to vector<8x1xf32>
    %183 = vector.broadcast %182 : vector<8x1xf32> to vector<8x8xf32>
    %184 = arith.mulf %180, %183 : vector<8x8xf32>
    %185 = vector.extract_strided_slice %181 {offsets = [0, 1], sizes = [8, 1], strides = [1, 1]} : vector<8x2xf32> to vector<8x1xf32>
    %186 = vector.broadcast %185 : vector<8x1xf32> to vector<8x8xf32>
    %187 = arith.addf %184, %186 : vector<8x8xf32>
    %cst_41 = arith.constant 0.000000e+00 : f32
    %188 = vector.broadcast %cst_41 : f32 to vector<8x8xf32>
    %189 = arith.maximumf %187, %188 : vector<8x8xf32>
    %c648 = arith.constant 648 : index
    %c0_42 = arith.constant 0 : index
    %190 = vector.load %arg2[%c648, %c0_42] : memref<672x256xf32, #tpu.memory_space<vmem>>, vector<2x8xf32>
    %cst_43 = arith.constant dense<0.000000e+00> : vector<2x8xf32>
    %191 = tpu.matmul %190, %189, %cst_43 {dimension_numbers = #tpu.dot_dimension_numbers<[1], [0], [0], [1], [0, 0, 1, 1], [], []>} : vector<2x8xf32>, vector<8x8xf32>, vector<2x8xf32> -> vector<2x8xf32>
    %c664 = arith.constant 664 : index
    %c0_44 = arith.constant 0 : index
    %192 = vector.load %arg2[%c664, %c0_44] : memref<672x256xf32, #tpu.memory_space<vmem>>, vector<8x8xf32>
    %cst_45 = arith.constant dense<0.000000e+00> : vector<2x8xf32>
    %193 = tpu.matmul %191, %192, %cst_45 {dimension_numbers = #tpu.dot_dimension_numbers<[1], [0], [0], [1], [0, 0, 1, 1], [], []>} : vector<2x8xf32>, vector<8x8xf32>, vector<2x8xf32> -> vector<2x8xf32>
    %c656 = arith.constant 656 : index
    %c0_46 = arith.constant 0 : index
    %194 = vector.load %arg2[%c656, %c0_46] : memref<672x256xf32, #tpu.memory_space<vmem>>, vector<1x8xf32>
    %195 = vector.broadcast %194 : vector<1x8xf32> to vector<2x8xf32>
    %196 = arith.addf %193, %195 : vector<2x8xf32>
    %197 = tpu.iota {dimensions = array<i32: 0>} : vector<2x1xi32>
    %cst_47 = arith.constant 0.000000e+00 : f32
    %198 = vector.broadcast %cst_47 : f32 to vector<2x1xf32>
    %c3 = arith.constant 3 : index
    %c15 = arith.constant 15 : index
    %199 = vector.load %arg1[%c3, %c15] : memref<8x16xf32, #tpu.memory_space<vmem>>, vector<1x1xf32>
    %c0_i32 = arith.constant 0 : i32
    %200 = vector.broadcast %c0_i32 : i32 to vector<2x1xi32>
    %201 = arith.cmpi eq, %197, %200 : vector<2x1xi32>
    %202 = vector.shape_cast %199 : vector<1x1xf32> to vector<1x1xf32>
    %203 = vector.broadcast %202 : vector<1x1xf32> to vector<2x1xf32>
    %204 = arith.select %201, %203, %198 : vector<2x1xi1>, vector<2x1xf32>
    %c7 = arith.constant 7 : index
    %c15_48 = arith.constant 15 : index
    %205 = vector.load %arg1[%c7, %c15_48] : memref<8x16xf32, #tpu.memory_space<vmem>>, vector<1x1xf32>
    %c1_i32 = arith.constant 1 : i32
    %206 = vector.broadcast %c1_i32 : i32 to vector<2x1xi32>
    %207 = arith.cmpi eq, %197, %206 : vector<2x1xi32>
    %208 = vector.shape_cast %205 : vector<1x1xf32> to vector<1x1xf32>
    %209 = vector.broadcast %208 : vector<1x1xf32> to vector<2x1xf32>
    %210 = arith.select %207, %209, %204 : vector<2x1xi1>, vector<2x1xf32>
    %211 = vector.broadcast %210 : vector<2x1xf32> to vector<2x8xf32>
    %212 = arith.addf %196, %211 : vector<2x8xf32>
    %c0_49 = arith.constant 0 : index
    %c0_50 = arith.constant 0 : index
    %213 = vector.load %arg3[%c0_49, %c0_50] : memref<2x8xf32, #tpu.memory_space<vmem>>, vector<2x8xf32>
    tpu.vector_store %arg3[%c0_49, %c0_50], %212 {strides = array<i32>} : memref<2x8xf32, #tpu.memory_space<vmem>>, vector<2x8xf32>,
    return
  }
  func.func @transform_0(%arg0: i32) -> (i32, i32) {
    %c0_i32 = arith.constant 0 : i32
    %c0_i32_0 = arith.constant 0 : i32
    %c0_i32_1 = arith.constant 0 : i32
    return %c0_i32, %c0_i32_0 : i32, i32
  }
  func.func @transform_1(%arg0: i32) -> (i32, i32) {
    %c0_i32 = arith.constant 0 : i32
    %c0_i32_0 = arith.constant 0 : i32
    %c0_i32_1 = arith.constant 0 : i32
    return %c0_i32, %c0_i32_0 : i32, i32
  }
  func.func @transform_2(%arg0: i32) -> (i32, i32) {
    %c0_i32 = arith.constant 0 : i32
    %c0_i32_0 = arith.constant 0 : i32
    %c0_i32_1 = arith.constant 0 : i32
    return %c0_i32, %c0_i32_0 : i32, i32
  }
}

</mosaic_0001>

<bundles_post_ra>
// kernel: scinet_forward.1
= control target key start
LH: loop header
LB: loop body
LE: loop exit
PB: predicated region body
PF: predicated region fallthrough
CT: control target
= control target key end

     0   :  { %7 = vsyncpa [#allocation3], 0  ;;  %s3759_s0 = inlined_call_operand.hbm [shape: f32[8,16], index: 0, kind: input, shape index: {}]   ;;  %s3760_s1 = inlined_call_operand.hbm [shape: f32[672,256], index: 1, kind: input, shape index: {}]   ;;  %s3761_s2 = inlined_call_operand.hbm [shape: f32[2,8], index: 2, kind: output, shape index: {}]  }
   0x1   :  { %8 = vsyncpa [#allocation6], 0 }
   0x2   :  { %9 = vsyncpa [#allocation4], 0  ;;  %s3440_s9 = smov [#allocation2]   ;;  %s3441_s11 = smov [#allocation5]  }
   0x3   :  { %s16_s10 = sshll.u32 %s3440_s9, 4  ;;  %s25_s12 = sshll.u32 %s3441_s11, 4  ;;  %s17_s10 = int_to_ptr.vmem [resolvable:$true] %s16_s10  ;;  %s3479_s12 = int_to_ptr.vmem [resolvable:$true] %s25_s12 }
   0x4   :  { %s3368_s15 = scalar_lea.hbm %s3759_s0, 128 }
   0x5   :  { %p3369_p0 = scmp.ne.s32.totalorder %s3759_s0, %s3368_s15  ;;  %p3372_p1 = scmp.lt.u32.totalorder %s3368_s15, %s3759_s0 }
   0x7   :  { %p3374_p2 = pnand %p3372_p1, %p3369_p0 }
   0x9   :  { %3377 = shalt.err (!%p3374_p2)
}
   0xa   :  { %s3378_s20 = scalar_lea.vmem %s17_s10, 128  ;;  %p3383_p4 = scmp.lt.s32.totalorder %s17_s10, %s17_s10 }
   0xb   :  { %p3379_p3 = scmp.ne.s32.totalorder %s17_s10, %s3378_s20  ;;  %p3384_p5 = scmp.lt.s32.totalorder %s3378_s20, %s3378_s20 }
   0xd   :  { %p3385_p6 = por %p3384_p5, %p3383_p4 }
   0xf   :  { %p3386_p7 = pnand %p3385_p6, %p3379_p3 }
  0x11   :  { %3389 = shalt.err (!%p3386_p7)
}
  0x12   :  { %19 = dma.hbm_to_vmem [thread:$0]  %s3759_s0, 128, %s17_s10, [#allocation3]  }
  0x13   :  { %s3390_s25 = scalar_lea.hbm %s3760_s1, 21504 }
  0x14   :  { %p3391_p8 = scmp.ne.s32.totalorder %s3760_s1, %s3390_s25  ;;  %p3394_p9 = scmp.lt.u32.totalorder %s3390_s25, %s3760_s1 }
  0x16   :  { %p3396_p10 = pnand %p3394_p9, %p3391_p8 }
  0x18   :  { %3399 = shalt.err (!%p3396_p10)
}
  0x19   :  { %s3400_s30 = scalar_lea.vmem %s3479_s12, 21504  ;;  %p3405_p12 = scmp.lt.s32.totalorder %s3479_s12, %s3479_s12 }
  0x1a   :  { %p3401_p11 = scmp.ne.s32.totalorder %s3479_s12, %s3400_s30  ;;  %p3406_p13 = scmp.lt.s32.totalorder %s3400_s30, %s3400_s30 }
  0x1c   :  { %p3407_p0 = por %p3406_p13, %p3405_p12 }
  0x1e   :  { %p3408_p1 = pnand %p3407_p0, %p3401_p11 }
  0x20   :  { %3411 = shalt.err (!%p3408_p1)
}
  0x21   :  { %s3442_s0 = smov 256   ;;  %s3443_s3 = smov 16  }
  0x22   :  { %31 = dma.hbm_to_vmem [thread:$0]  %s3760_s1, 21504, %s3479_s12, [#allocation6], %s3442_s0, %s3442_s0, %s3443_s3  }
  0x23   :  { %3434 = dma.done.wait [#allocation3], 128  }
  0x24   :  { %3435 = vsyncadd [#allocation3], 4294967168 }
  0x25   :  { %3436 = dma.done.wait [#allocation6], 21504  }
  0x26   :  { %3437 = vsyncadd [#allocation6], 4294945792  ;;  %v3444_v0 = vmov 0   ;;  %v38_v1 = vld [vmem:[#allocation5] sm:$0xff]  ;;  %v75_v2 = vld [vmem:[#allocation5 + $0x190] sm:$0xff]  ;;  %v3445_v4 = vmov 0.0|0.0  }
  0x27   :  { %3081 = vset.pattern.permute.xlu0 %v3444_v0  ;;  %3104 = vset.pattern.permute.xlu1 %v3444_v0  ;;  %v76_v3 = vld [vmem:[#allocation5 + $0x1a0] sm:$0xff]  ;;  %v3446_v6 = vmov 1   ;;  %vm3447_vm0 = vmmov 0   ;;  %v3448_v7 = vmov 0.0   ;;  %v39_v9 = vld [vmem:[#allocation2] sm:$0xff]  ;;  %vm78_vm1 = vcmask 130048  }
  0x28   :  { %42 = vperm.xlu0 %3081, %v38_v1   ;;  %2828 = vmatprep.subr.bf16.mxu0 %v3445_v4  ;;  %v2829_v5 = vpack.c.bf16 %v76_v3, %v75_v2  ;;  %s3449_s1 = smov 114   ;;  %s3450_s6 = smov 125   ;;  %v51_v18 = vld [vmem:[#allocation5 + $0x10] sm:$0xff]  ;;  %vm200_vm2 = vcmask 654336   ;;  %v60_v20 = vld [vmem:[#allocation5 + $0xa0] sm:$0xff]  ;;  %vm348_vm7 = vcmask 785408  }
  0x29   :  { %2671 = vmatprep.mubr.msk.f32.mxu0 %vm3447_vm0, %v3448_v7  ;;  %s3451_s7 = smov 127   ;;  %s3452_s8 = smov 126   ;;  %2694 = vmatprep.mubr.msk.f32.mxu1 %vm200_vm2, %v51_v18  ;;  %v59_v19 = vld [vmem:[#allocation5 + $0x90] sm:$0xff]  ;;  %v62_v21 = vld [vmem:[#allocation5 + $0xc0] sm:$0xff]  ;;  %vm454_vm8 = vcmask 64512   ;;  %vm1077_vm13 = vcmask 261120  }
  0x2a   :  { %2830 = vmatpush3.bf16.msra.mxu0 %v2829_v5  ;;  %s3453_s9 = smov 124   ;;  %v61_v22 = vld [vmem:[#allocation5 + $0xb0] sm:$0xff]  ;;  %v52_v39 = vld [vmem:[#allocation5 + $0x20] sm:$0xff]  ;;  %s3454_s10 = smov 3  }
  0x2b   :  { %v53_v40 = vld [vmem:[#allocation5 + $0x30] sm:$0xff]  ;;  %v54_v41 = vld [vmem:[#allocation5 + $0x40] sm:$0xff]  ;;  %s3455_s11 = smov 17   ;;  %s3456_s12 = smov 14  }
  0x2c   :  { %3082 = vset.pattern.permute.xlu0 %v3446_v6  ;;  %v67_v2 = vld [vmem:[#allocation5 + $0x110] sm:$0xff]  ;;  %v72_v3 = vld [vmem:[#allocation5 + $0x160] sm:$0xff]  ;;  %s3457_s13 = smov 111   ;;  %s3458_s14 = smov 118  }
  0x2d   :  { %47 = vperm.xlu0 %3082, %v38_v1   ;;  %v71_v5 = vld [vmem:[#allocation5 + $0x150] sm:$0xff]  ;;  %s3459_s15 = smov 13   ;;  %s3460_s16 = smov 10  }
  0x2e   :  { %s3461_s17 = smov 115   ;;  %s3463_s18 = smov [#allocation7]  }
  0x2f   :  { %s2517_s19 = sshll.u32 %s3463_s18, 4  ;;  %s2518_s19 = int_to_ptr.vmem [resolvable:$true] %s2517_s19 }
  0x30   :  { %s3412_s20 = scalar_lea.vmem %s2518_s19, 32  ;;  %p3417_p3 = scmp.lt.s32.totalorder %s2518_s19, %s2518_s19 }
  0x31   :  { %3103 = vset.pattern.permute.xlu0 %v3444_v0  ;;  %p3413_p2 = scmp.ne.s32.totalorder %s2518_s19, %s3412_s20  ;;  %p3418_p4 = scmp.lt.s32.totalorder %s3412_s20, %s3412_s20 }
  0x33   :  { %p3419_p5 = por %p3418_p4, %p3417_p3 }
  0x35   :  { %p3420_p6 = pnand %p3419_p5, %p3413_p2 }
  0xa7   :  { %v43_v8 = vpop.permute.xlu0 %42 }
  0xa8   :  { %v45_v10 = vmul.f32 %v43_v8, %v39_v9 }
  0xac   :  { %v48_v11 = vpop.permute.xlu0 %47 }
  0xad   :  { %v50_v12 = vadd.f32 %v48_v11, %v45_v10 }
  0xaf   :  { %2672 = vmatmul.mubr.msk.f32.vlgmr.msra.gmra.mrb[0].mxu0 %vm78_vm1, %v50_v12 }
  0xb0   :  { %2724 = vmatprep.mubr.msk.f32.mxu0 %vm348_vm7, %v67_v2 }
 0x182   :  { %v3514_v13 = vpop.f32.mrb[0].mxu0 }
 0x183   :  { %153 = vrot.lane.b32.xlu1 %v3514_v13, %s3449_s1  ;;  %v2673_v14 = vpop.f32.mrb[1].mxu0 }
 0x1f5   :  { %v154_v15 = vpop.permute.xlu1 %153 }
 0x1f6   :  { %v2831_v16 = vpack.c.bf16 %v154_v15, %v3514_v13  ;;  %v3093_v17 = vpack.i.bf16 %v154_v15, %v3514_v13 }
 0x1f8   :  { %2832 = vmatprep.subr.bf16.mxu1 %v2831_v16  ;;  %3094 = vrot.lane.b32.xlu0 %v3093_v17, %s3450_s6 }
 0x1f9   :  { %3084 = vrot.lane.b32.xlu1 %v3093_v17, %s3451_s7  ;;  %2834 = vmatpush3.bf16.msra.mxu1 %v2831_v16 }
 0x1fc   :  { %182 = vperm.xlu0 %3103, %v59_v19  }
 0x1fd   :  { %3089 = vrot.lane.b32.xlu1 %v3093_v17, %s3452_s8 }
 0x200   :  { %197 = vperm.xlu0 %3103, %v62_v21  }
 0x201   :  { %3099 = vrot.lane.b32.xlu1 %v3093_v17, %s3453_s9 }
 0x205   :  { %187 = vperm.xlu1 %3104, %v60_v20  }
 0x209   :  { %192 = vperm.xlu1 %3104, %v61_v22  }
 0x26a   :  { %v3095_v26 = vpop.permute.xlu0 %3094 }
 0x26b   :  { %v3085_v23 = vpop.permute.xlu1 %3084  ;;  %v3097_v29 = vunpack.i.h.bf16 %v3095_v26  ;;  %v3096_v30 = vunpack.i.l.bf16 %v3095_v26 }
 0x26c   :  { %v3087_v24 = vunpack.i.h.bf16 %v3085_v23  ;;  %v3086_v25 = vunpack.i.l.bf16 %v3085_v23 }
 0x26d   :  { %v2843_v37 = vpack.c.bf16 %v3097_v29, %v3096_v30 }
 0x26e   :  { %v2835_v27 = vpack.c.bf16 %v3087_v24, %v3086_v25  ;;  %v68_v25 = vld [vmem:[#allocation5 + $0x120] sm:$0xff] }
 0x26f   :  { %v3090_v28 = vpop.permute.xlu1 %3089 }
 0x270   :  { %v3092_v31 = vunpack.i.h.bf16 %v3090_v28  ;;  %v3091_v32 = vunpack.i.l.bf16 %v3090_v28  ;;  %2836 = vmatprep.subr.bf16.mxu1 %v2835_v27 }
 0x271   :  { %2838 = vmatpush3.bf16.msra.mxu1 %v2835_v27 }
 0x272   :  { %v2839_v33 = vpack.c.bf16 %v3092_v31, %v3091_v32 }
 0x273   :  { %v3100_v34 = vpop.permute.xlu1 %3099 }
 0x274   :  { %v3102_v35 = vunpack.i.h.bf16 %v3100_v34  ;;  %v3101_v36 = vunpack.i.l.bf16 %v3100_v34  ;;  %2840 = vmatprep.subr.bf16.mxu1 %v2839_v33 }
 0x275   :  { %2842 = vmatpush3.bf16.msra.mxu1 %v2839_v33 }
 0x276   :  { %2844 = vmatprep.subr.bf16.mxu1 %v2843_v37  ;;  %v2847_v38 = vpack.c.bf16 %v3102_v35, %v3101_v36 }
 0x279   :  { %2846 = vmatpush3.bf16.msra.mxu1 %v2843_v37 }
 0x27a   :  { %2848 = vmatprep.subr.bf16.mxu1 %v2847_v38 }
 0x27b   :  { %v183_v42 = vpop.permute.xlu0 %182 }
 0x27d   :  { %2850 = vmatpush3.bf16.msra.mxu1 %v2847_v38  ;;  %v77_v38 = vld [vmem:[#allocation5 + $0x1b0] sm:$0xff] }
 0x27e   :  { %2727 = vmatprep.subr.mxu1 %v77_v38 }
 0x27f   :  { %v198_v49 = vpop.permute.xlu0 %197 }
 0x280   :  { %2695 = vmatmul.mubr.msk.f32.vlgmr.msra.gmra.mrb[0].mxu1 %vm200_vm2, %v52_v39 }
 0x281   :  { %2697 = vmatprep.mubr.msk.f32.mxu1 %vm200_vm2, %v53_v40  ;;  %2728 = vmatpush3.msra.mxu1 %v77_v38  ;;  %v74_v38 = vld [vmem:[#allocation5 + $0x180] sm:$0xff] }
 0x284   :  { %2698 = vmatmul.mubr.msk.f32.gmra.mrb[2].mxu1 %vm200_vm2, %v54_v41  ;;  %v188_v43 = vpop.permute.xlu1 %187 }
 0x288   :  { %v193_v53 = vpop.permute.xlu1 %192 }
 0x353   :  { %v2696_v44 = vpop.f32.mrb[0].mxu1 }
 0x354   :  { %v285_v45 = vadd.f32 %v2696_v44, %v188_v43  ;;  %v279_v46 = vpop.f32.mrb[1].mxu1 }
 0x355   :  { %v280_v47 = vadd.f32 %v279_v46, %v183_v42 }
 0x356   :  { %vm299_vm3 = vcmp.gt.f32.partialorder %v285_v45, 0.0  ;;  %v303_v48 = vmul.f32 0.01, %v285_v45 }
 0x357   :  { %vm298_vm4 = vcmp.gt.f32.partialorder %v280_v47, 0.0  ;;  %v302_v50 = vmul.f32 0.01, %v280_v47  ;;  %v2699_v51 = vpop.f32.mrb[2].mxu1 }
 0x358   :  { %v307_v52 = vsel %vm299_vm3, %v285_v45, %v303_v48  ;;  %v295_v54 = vadd.f32 %v2699_v51, %v198_v49  ;;  %v289_v55 = vpop.f32.mrb[3].mxu1  ;;  %v55_v49 = vld [vmem:[#allocation5 + $0x50] sm:$0xff] }
 0x359   :  { %v306_v56 = vsel %vm298_vm4, %v280_v47, %v302_v50  ;;  %v290_v57 = vadd.f32 %v289_v55, %v193_v53  ;;  %v64_v50 = vld [vmem:[#allocation5 + $0xe0] sm:$0xff]  ;;  %v63_v51 = vld [vmem:[#allocation5 + $0xd0] sm:$0xff] }
 0x35a   :  { %vm301_vm5 = vcmp.gt.f32.partialorder %v295_v54, 0.0  ;;  %v305_v58 = vmul.f32 0.01, %v295_v54  ;;  %v3105_v59 = vpack.i.bf16 %v307_v52, %v306_v56  ;;  %v2851_v60 = vpack.c.bf16 %v307_v52, %v306_v56  ;;  %v66_v52 = vld [vmem:[#allocation5 + $0x100] sm:$0xff]  ;;  %v65_v53 = vld [vmem:[#allocation5 + $0xf0] sm:$0xff] }
 0x35b   :  { %vm300_vm6 = vcmp.gt.f32.partialorder %v290_v57, 0.0  ;;  %v304_v61 = vmul.f32 0.01, %v290_v57 }
 0x35c   :  { %v309_v62 = vsel %vm301_vm5, %v295_v54, %v305_v58  ;;  %3106 = vrot.lane.b32.xlu1 %v3105_v59, %s3451_s7  ;;  %2852 = vmatprep.subr.bf16.mxu0 %v2851_v60 }
 0x35d   :  { %v308_v63 = vsel %vm300_vm6, %v290_v57, %v304_v61  ;;  %2854 = vmatpush3.bf16.msra.mxu0 %v2851_v60 }
 0x35e   :  { %v3110_v0 = vpack.i.bf16 %v309_v62, %v308_v63  ;;  %v2855_v1 = vpack.c.bf16 %v309_v62, %v308_v63 }
 0x360   :  { %3111 = vrot.lane.b32.xlu0 %v3110_v0, %s3451_s7  ;;  %3116 = vrot.lane.b32.xlu1 %v3105_v59, %s3452_s8 }
 0x361   :  { %2856 = vmatprep.subr.bf16.mxu0 %v2855_v1 }
 0x362   :  { %2858 = vmatpush3.bf16.msra.mxu0 %v2855_v1 }
 0x364   :  { %3121 = vrot.lane.b32.xlu0 %v3110_v0, %s3452_s8  ;;  %345 = vperm.xlu1 %3104, %v72_v3  }
 0x368   :  { %340 = vperm.xlu0 %3103, %v71_v5  }
 0x3ce   :  { %v3107_v8 = vpop.permute.xlu1 %3106 }
 0x3cf   :  { %v3109_v9 = vunpack.i.h.bf16 %v3107_v8  ;;  %v3108_v10 = vunpack.i.l.bf16 %v3107_v8 }
 0x3d1   :  { %v2859_v11 = vpack.c.bf16 %v3109_v9, %v3108_v10  ;;  %v56_v9 = vld [vmem:[#allocation5 + $0x60] sm:$0xff]  ;;  %v57_v10 = vld [vmem:[#allocation5 + $0x70] sm:$0xff] }
 0x3d2   :  { %v3112_v12 = vpop.permute.xlu0 %3111  ;;  %v3117_v14 = vpop.permute.xlu1 %3116 }
 0x3d3   :  { %v3114_v15 = vunpack.i.h.bf16 %v3112_v12  ;;  %v3113_v16 = vunpack.i.l.bf16 %v3112_v12  ;;  %v3119_v17 = vunpack.i.h.bf16 %v3117_v14  ;;  %v3118_v18 = vunpack.i.l.bf16 %v3117_v14  ;;  %2860 = vmatprep.subr.bf16.mxu0 %v2859_v11 }
 0x3d4   :  { %2862 = vmatpush3.bf16.msra.mxu0 %v2859_v11  ;;  %v58_v11 = vld [vmem:[#allocation5 + $0x80] sm:$0xff] }
 0x3d5   :  { %v2863_v19 = vpack.c.bf16 %v3114_v15, %v3113_v16  ;;  %v2867_v23 = vpack.c.bf16 %v3119_v17, %v3118_v18 }
 0x3d6   :  { %v3122_v20 = vpop.permute.xlu0 %3121 }
 0x3d7   :  { %v3124_v21 = vunpack.i.h.bf16 %v3122_v20  ;;  %v3123_v22 = vunpack.i.l.bf16 %v3122_v20  ;;  %2864 = vmatprep.subr.bf16.mxu0 %v2863_v19 }
 0x3d8   :  { %2866 = vmatpush3.bf16.msra.mxu0 %v2863_v19 }
 0x3d9   :  { %2868 = vmatprep.subr.bf16.mxu0 %v2867_v23  ;;  %v2871_v24 = vpack.c.bf16 %v3124_v21, %v3123_v22 }
 0x3dc   :  { %2870 = vmatpush3.bf16.msra.mxu0 %v2867_v23 }
 0x3dd   :  { %2872 = vmatprep.subr.bf16.mxu0 %v2871_v24 }
 0x3e0   :  { %2874 = vmatpush3.bf16.msra.mxu0 %v2871_v24 }
 0x3e3   :  { %2725 = vmatmul.mubr.msk.f32.vlgmr.msra.gmra.mrb[2].mxu0 %vm348_vm7, %v68_v25  ;;  %v346_v26 = vpop.permute.xlu1 %345 }
 0x3e4   :  { %2752 = vmatprep.mubr.msk.f32.mxu0 %vm200_vm2, %v55_v49 }
 0x3e7   :  { %v341_v28 = vpop.permute.xlu0 %340 }
 0x4b6   :  { %v2726_v27 = vpop.f32.mrb[2].mxu0 }
 0x4b7   :  { %v427_v29 = vadd.f32 %v2726_v27, %v346_v26  ;;  %v421_v30 = vpop.f32.mrb[3].mxu0 }
 0x4b8   :  { %v422_v31 = vadd.f32 %v421_v30, %v341_v28 }
 0x4b9   :  { %3332 = vtanh.f32 %v427_v29 }
 0x4ba   :  { %3334 = vtanh.f32 %v422_v31 }
 0x4c3   :  { %v3333_v32 = vpop.eup %3332 }
 0x4c4   :  { %v3335_v33 = vpop.eup %3334  ;;  %v439_v34 = vmul.f32 1.442695, %v3333_v32 }
 0x4c5   :  { %v432_v35 = vmul.f32 1.442695, %v3335_v33 }
 0x4c6   :  { %3336 = vpow2.f32 %v439_v34 }
 0x4c7   :  { %3338 = vpow2.f32 %v432_v35 }
 0x4d0   :  { %v3337_v36 = vpop.eup %3336 }
 0x4d1   :  { %v3339_v37 = vpop.eup %3338  ;;  %442 = vrot.lane.b32.xlu1 %v3337_v36, %s3454_s10 }
 0x4d2   :  { %435 = vrot.lane.b32.xlu0 %v3339_v37, %s3455_s11  ;;  %v69_v37 = vld [vmem:[#allocation5 + $0x130] sm:$0xff] }
 0x543   :  { %v443_v39 = vpop.permute.xlu1 %442 }
 0x544   :  { %v3537_v40 = vmul.f32 %v443_v39, %v3514_v13  ;;  %v436_v41 = vpop.permute.xlu0 %435  ;;  %v73_v39 = vld [vmem:[#allocation5 + $0x170] sm:$0xff] }
 0x545   :  { %v3540_v42 = vmul.f32 %v436_v41, %v3514_v13 }
 0x546   :  { %447 = vrot.lane.b32.xlu1 %v3537_v40, %s3456_s12 }
 0x547   :  { %450 = vrot.lane.b32.xlu0 %v3540_v42, %s3457_s13 }
 0x5b8   :  { %v448_v43 = vpop.permute.xlu1 %447 }
 0x5b9   :  { %452 = vrot.lane.b32.xlu1 %v448_v43, %s3457_s13  ;;  %v451_v44 = vpop.permute.xlu0 %450 }
 0x5ba   :  { %2729 = vmatprep.mubr.msk.f32.mxu1 %vm454_vm8, %v451_v44 }
 0x62b   :  { %v453_v45 = vpop.permute.xlu1 %452 }
 0x62c   :  { %2730 = vmatmul.mubr.msk.f32.vlgmr.msra.gmra.mrb[4].mxu1 %vm454_vm8, %v453_v45 }
 0x62d   :  { %2782 = vmatprep.mubr.msk.f32.mxu1 %vm348_vm7, %v69_v37 }
 0x6ff   :  { %v2731_v46 = vpop.f32.mrb[4].mxu1 }
 0x700   :  { %v525_v47 = vpop.f32.mrb[5].mxu1 }
 0x701   :  { %v3130_v48 = vpack.i.bf16 %v2731_v46, %v525_v47  ;;  %v2875_v13 = vpack.c.bf16 %v2731_v46, %v525_v47 }
 0x703   :  { %3131 = vrot.lane.b32.xlu1 %v3130_v48, %s3452_s8  ;;  %3126 = vrot.lane.b32.xlu0 %v3130_v48, %s3451_s7 }
 0x704   :  { %2876 = vmatprep.subr.bf16.mxu0 %v2875_v13 }
 0x705   :  { %2878 = vmatpush3.bf16.msra.mxu0 %v2875_v13 }
 0x707   :  { %3141 = vrot.lane.b32.xlu1 %v3130_v48, %s3453_s9  ;;  %3136 = vrot.lane.b32.xlu0 %v3130_v48, %s3450_s6 }
 0x70b   :  { %567 = vperm.xlu1 %3104, %v64_v50   ;;  %562 = vperm.xlu0 %3103, %v63_v51  }
 0x70f   :  { %577 = vperm.xlu1 %3104, %v66_v52   ;;  %572 = vperm.xlu0 %3103, %v65_v53  }
 0x775   :  { %v3132_v54 = vpop.permute.xlu1 %3131  ;;  %v3127_v55 = vpop.permute.xlu0 %3126 }
 0x776   :  { %v3134_v56 = vunpack.i.h.bf16 %v3132_v54  ;;  %v3133_v57 = vunpack.i.l.bf16 %v3132_v54  ;;  %v3129_v58 = vunpack.i.h.bf16 %v3127_v55  ;;  %v3128_v59 = vunpack.i.l.bf16 %v3127_v55 }
 0x778   :  { %v2879_v60 = vpack.c.bf16 %v3129_v58, %v3128_v59  ;;  %v2883_v62 = vpack.c.bf16 %v3134_v56, %v3133_v57  ;;  %v70_v57 = vld [vmem:[#allocation5 + $0x140] sm:$0xff] }
 0x779   :  { %v3137_v61 = vpop.permute.xlu0 %3136  ;;  %v3142_v1 = vpop.permute.xlu1 %3141 }
 0x77a   :  { %v3139_v63 = vunpack.i.h.bf16 %v3137_v61  ;;  %v3138_v0 = vunpack.i.l.bf16 %v3137_v61  ;;  %2880 = vmatprep.subr.bf16.mxu0 %v2879_v60  ;;  %v3144_v2 = vunpack.i.h.bf16 %v3142_v1  ;;  %v3143_v3 = vunpack.i.l.bf16 %v3142_v1 }
 0x77b   :  { %2882 = vmatpush3.bf16.msra.mxu0 %v2879_v60 }
 0x77c   :  { %2884 = vmatprep.subr.bf16.mxu0 %v2883_v62  ;;  %v2887_v5 = vpack.c.bf16 %v3139_v63, %v3138_v0  ;;  %v2891_v8 = vpack.c.bf16 %v3144_v2, %v3143_v3  ;;  %v895_v2 = vld [vmem:[#allocation5 + $0x4c0] sm:$0xff] }
 0x77f   :  { %2886 = vmatpush3.bf16.msra.mxu0 %v2883_v62 }
 0x780   :  { %2888 = vmatprep.subr.bf16.mxu0 %v2887_v5 }
 0x783   :  { %2890 = vmatpush3.bf16.msra.mxu0 %v2887_v5 }
 0x784   :  { %2892 = vmatprep.subr.bf16.mxu0 %v2891_v8 }
 0x787   :  { %2894 = vmatpush3.bf16.msra.mxu0 %v2891_v8 }
 0x788   :  { %2785 = vmatprep.subr.mxu0 %v895_v2 }
 0x78a   :  { %2753 = vmatmul.mubr.msk.f32.vlgmr.msra.gmra.mrb[4].mxu0 %vm200_vm2, %v56_v9  ;;  %v568_v12 = vpop.permute.xlu1 %567  ;;  %v563_v14 = vpop.permute.xlu0 %562 }
 0x78b   :  { %2755 = vmatprep.mubr.msk.f32.mxu0 %vm200_vm2, %v57_v10  ;;  %2786 = vmatpush3.msra.mxu0 %v895_v2  ;;  %v827_v2 = vld [vmem:[#allocation5 + $0x1e0] sm:$0xff] }
 0x78c   :  { %2949 = vmatprep.subr.bf16.mxu0 %v3445_v4 }
 0x78e   :  { %2756 = vmatmul.mubr.msk.f32.gmra.mrb[6].mxu0 %vm200_vm2, %v58_v11  ;;  %v578_v20 = vpop.permute.xlu1 %577  ;;  %v573_v23 = vpop.permute.xlu0 %572 }
 0x85d   :  { %v2754_v15 = vpop.f32.mrb[4].mxu0 }
 0x85e   :  { %v664_v16 = vadd.f32 %v2754_v15, %v568_v12  ;;  %v658_v17 = vpop.f32.mrb[5].mxu0 }
 0x85f   :  { %v659_v18 = vadd.f32 %v658_v17, %v563_v14  ;;  %v857_v17 = vld [vmem:[#allocation5 + $0x2e0] sm:$0xff] }
 0x860   :  { %vm678_vm9 = vcmp.gt.f32.partialorder %v664_v16, 0.0  ;;  %v682_v19 = vmul.f32 0.01, %v664_v16 }
 0x861   :  { %vm677_vm10 = vcmp.gt.f32.partialorder %v659_v18, 0.0  ;;  %v681_v21 = vmul.f32 0.01, %v659_v18  ;;  %v2757_v22 = vpop.f32.mrb[6].mxu0 }
 0x862   :  { %v686_v24 = vsel %vm678_vm9, %v664_v16, %v682_v19  ;;  %v674_v25 = vadd.f32 %v2757_v22, %v578_v20  ;;  %v668_v26 = vpop.f32.mrb[7].mxu0  ;;  %v855_v16 = vld [vmem:[#allocation5 + $0x2c0] sm:$0xff]  ;;  %vm1462_vm9 = vcmask 1043456  }
 0x863   :  { %v685_v27 = vsel %vm677_vm10, %v659_v18, %v681_v21  ;;  %v669_v28 = vadd.f32 %v668_v26, %v573_v23  ;;  %v859_v18 = vld [vmem:[#allocation5 + $0x300] sm:$0xff]  ;;  %vm1453_vm10 = vcmask 31744  }
 0x864   :  { %vm680_vm11 = vcmp.gt.f32.partialorder %v674_v25, 0.0  ;;  %v684_v29 = vmul.f32 0.01, %v674_v25  ;;  %v3145_v30 = vpack.i.bf16 %v686_v24, %v685_v27  ;;  %v2895_v31 = vpack.c.bf16 %v686_v24, %v685_v27  ;;  %v861_v19 = vld [vmem:[#allocation5 + $0x320] sm:$0xff] }
 0x865   :  { %vm679_vm12 = vcmp.gt.f32.partialorder %v669_v28, 0.0  ;;  %v683_v32 = vmul.f32 0.01, %v669_v28 }
 0x866   :  { %v688_v33 = vsel %vm680_vm11, %v674_v25, %v684_v29  ;;  %3146 = vrot.lane.b32.xlu0 %v3145_v30, %s3451_s7  ;;  %2896 = vmatprep.subr.bf16.mxu1 %v2895_v31  ;;  %v824_v29 = vld [vmem:[#allocation5 + $0x1c8] sm:$0xff] }
 0x867   :  { %v687_v34 = vsel %vm679_vm12, %v669_v28, %v683_v32  ;;  %2898 = vmatpush3.bf16.msra.mxu1 %v2895_v31  ;;  %v856_v28 = vld [vmem:[#allocation5 + $0x2d0] sm:$0xff] }
 0x868   :  { %v3150_v35 = vpack.i.bf16 %v688_v33, %v687_v34  ;;  %v2899_v36 = vpack.c.bf16 %v688_v33, %v687_v34  ;;  %v860_v31 = vld [vmem:[#allocation5 + $0x310] sm:$0xff] }
 0x869   :  { %v862_v32 = vld [vmem:[#allocation5 + $0x330] sm:$0xff] }
 0x86a   :  { %3151 = vrot.lane.b32.xlu1 %v3150_v35, %s3451_s7  ;;  %3156 = vrot.lane.b32.xlu0 %v3145_v30, %s3452_s8  ;;  %v858_v30 = vld [vmem:[#allocation5 + $0x2f0] sm:$0xff] }
 0x86b   :  { %2900 = vmatprep.subr.bf16.mxu1 %v2899_v36 }
 0x86c   :  { %2902 = vmatpush3.bf16.msra.mxu1 %v2899_v36 }
 0x86e   :  { %3161 = vrot.lane.b32.xlu1 %v3150_v35, %s3452_s8  ;;  %724 = vperm.xlu0 %3103, %v74_v38  }
 0x872   :  { %719 = vperm.xlu1 %3104, %v73_v39  }
 0x8d8   :  { %v3147_v41 = vpop.permute.xlu0 %3146 }
 0x8d9   :  { %v3149_v43 = vunpack.i.h.bf16 %v3147_v41  ;;  %v3148_v44 = vunpack.i.l.bf16 %v3147_v41 }
 0x8db   :  { %v2903_v45 = vpack.c.bf16 %v3149_v43, %v3148_v44 }
 0x8dc   :  { %v3152_v46 = vpop.permute.xlu1 %3151  ;;  %v3157_v47 = vpop.permute.xlu0 %3156 }
 0x8dd   :  { %v3154_v48 = vunpack.i.h.bf16 %v3152_v46  ;;  %v3153_v13 = vunpack.i.l.bf16 %v3152_v46  ;;  %v3159_v49 = vunpack.i.h.bf16 %v3157_v47  ;;  %v3158_v50 = vunpack.i.l.bf16 %v3157_v47  ;;  %2904 = vmatprep.subr.bf16.mxu1 %v2903_v45 }
 0x8de   :  { %2906 = vmatpush3.bf16.msra.mxu1 %v2903_v45 }
 0x8df   :  { %v2907_v51 = vpack.c.bf16 %v3154_v48, %v3153_v13  ;;  %v2911_v53 = vpack.c.bf16 %v3159_v49, %v3158_v50 }
 0x8e0   :  { %v3162_v52 = vpop.permute.xlu1 %3161 }
 0x8e1   :  { %v3164_v54 = vunpack.i.h.bf16 %v3162_v52  ;;  %v3163_v55 = vunpack.i.l.bf16 %v3162_v52  ;;  %2908 = vmatprep.subr.bf16.mxu1 %v2907_v51 }
 0x8e2   :  { %2910 = vmatpush3.bf16.msra.mxu1 %v2907_v51 }
 0x8e3   :  { %2912 = vmatprep.subr.bf16.mxu1 %v2911_v53  ;;  %v2915_v56 = vpack.c.bf16 %v3164_v54, %v3163_v55 }
 0x8e6   :  { %2914 = vmatpush3.bf16.msra.mxu1 %v2911_v53 }
 0x8e7   :  { %2916 = vmatprep.subr.bf16.mxu1 %v2915_v56 }
 0x8ea   :  { %2918 = vmatpush3.bf16.msra.mxu1 %v2915_v56 }
 0x8eb   :  { %2919 = vmatprep.subr.bf16.mxu1 %v3445_v4 }
 0x8ed   :  { %2783 = vmatmul.mubr.msk.f32.vlgmr.msra.gmra.mrb[6].mxu1 %vm348_vm7, %v70_v57  ;;  %v725_v58 = vpop.permute.xlu0 %724  ;;  %vm1307_vm7 = vcmask 523264  }
 0x8ee   :  { %2544 = vmatprep.mubr.msk.f32.mxu1 %vm1077_vm13, %v824_v29 }
 0x8f1   :  { %v720_v60 = vpop.permute.xlu1 %719 }
 0x9c0   :  { %v2784_v59 = vpop.f32.mrb[6].mxu1 }
 0x9c1   :  { %v805_v61 = vadd.f32 %v2784_v59, %v725_v58  ;;  %v799_v62 = vpop.f32.mrb[7].mxu1 }
 0x9c2   :  { %v800_v63 = vadd.f32 %v799_v62, %v720_v60  ;;  %v823_v62 = vld [vmem:[#allocation5 + $0x1c0] sm:$0xff] }
 0x9c3   :  { %3340 = vtanh.f32 %v805_v61 }
 0x9c4   :  { %3342 = vtanh.f32 %v800_v63  ;;  %v826_v63 = vld [vmem:[#allocation5 + $0x1d8] sm:$0xff] }
 0x9cd   :  { %v3341_v0 = vpop.eup %3340 }
 0x9ce   :  { %v3343_v1 = vpop.eup %3342  ;;  %816 = vrot.lane.b32.xlu0 %v3341_v0, %s3455_s11  ;;  %v825_v0 = vld [vmem:[#allocation5 + $0x1d0] sm:$0xff] }
 0x9cf   :  { %811 = vrot.lane.b32.xlu1 %v3343_v1, %s3454_s10  ;;  %v828_v1 = vld [vmem:[#allocation5 + $0x1e8] sm:$0xff] }
 0xa40   :  { %v817_v3 = vpop.permute.xlu0 %816 }
 0xa41   :  { %v819_v5 = vsub.f32 %v3540_v42, %v817_v3  ;;  %v812_v8 = vpop.permute.xlu1 %811  ;;  %v830_v3 = vld [vmem:[#allocation5 + $0x1f8] sm:$0xff] }
 0xa42   :  { %v814_v9 = vadd.f32 %v812_v8, %v3537_v40  ;;  %v832_v8 = vld [vmem:[#allocation5 + $0x208] sm:$0xff] }
 0xa43   :  { %821 = vrot.lane.b32.xlu0 %v819_v5, %s3449_s1  ;;  %v829_v5 = vld [vmem:[#allocation5 + $0x1f0] sm:$0xff] }
 0xa44   :  { %898 = vrot.lane.b32.xlu1 %v814_v9, %s3450_s6  ;;  %v831_v9 = vld [vmem:[#allocation5 + $0x200] sm:$0xff] }
 0xab5   :  { %v822_v10 = vpop.permute.xlu0 %821 }
 0xab6   :  { %900 = vrot.lane.b32.xlu0 %v822_v10, %s3450_s6  ;;  %v899_v11 = vpop.permute.xlu1 %898  ;;  %v834_v10 = vld [vmem:[#allocation5 + $0x218] sm:$0xff] }
 0xab7   :  { %2787 = vmatprep.mubr.msk.f32.mxu0 %vm454_vm8, %v899_v11  ;;  %v833_v11 = vld [vmem:[#allocation5 + $0x210] sm:$0xff] }
 0xb28   :  { %v901_v12 = vpop.permute.xlu0 %900 }
 0xb29   :  { %2788 = vmatmul.mubr.msk.f32.vlgmr.msra.gmra.mrb[8].mxu0 %vm454_vm8, %v901_v12  ;;  %v836_v12 = vld [vmem:[#allocation5 + $0x228] sm:$0xff] }
 0xbfc   :  { %v3571_v14 = vpop.f32.mrb[8].mxu0 }
 0xbfd   :  { %v3573_v15 = vpop.f32.mrb[9].mxu0 }
 0xbfe   :  { %v3170_v40 = vpack.i.bf16 %v3571_v14, %v3573_v15  ;;  %v2920_v42 = vpack.c.bf16 %v3571_v14, %v3573_v15 }
 0xc00   :  { %3171 = vrot.lane.b32.xlu0 %v3170_v40, %s3451_s7  ;;  %3166 = vrot.lane.b32.xlu1 %v3170_v40, %s3458_s14 }
 0xc01   :  { %2921 = vmatpush1.bf16.msra.mxu1 %v2920_v42  ;;  %v838_v42 = vld [vmem:[#allocation5 + $0x238] sm:$0xff] }
 0xc02   :  { %2922 = vmatprep.subr.bf16.mxu1 %v3445_v4 }
 0xc04   :  { %3181 = vrot.lane.b32.xlu0 %v3170_v40, %s3452_s8 }
 0xc08   :  { %3191 = vrot.lane.b32.xlu0 %v3170_v40, %s3450_s6 }
 0xc0c   :  { %3201 = vrot.lane.b32.xlu0 %v3170_v40, %s3453_s9  ;;  %v835_v40 = vld [vmem:[#allocation5 + $0x220] sm:$0xff] }
 0xc10   :  { %1039 = vperm.xlu0 %3103, %v855_v16   ;;  %v837_v16 = vld [vmem:[#allocation5 + $0x230] sm:$0xff] }
 0xc14   :  { %1049 = vperm.xlu0 %3103, %v857_v17  }
 0xc18   :  { %1059 = vperm.xlu0 %3103, %v859_v18  }
 0xc1c   :  { %1069 = vperm.xlu0 %3103, %v861_v19  }
 0xc72   :  { %v3172_v20 = vpop.permute.xlu0 %3171  ;;  %v3167_v21 = vpop.permute.xlu1 %3166 }
 0xc73   :  { %v3169_v22 = vunpack.i.h.bf16 %v3167_v21  ;;  %v3168_v23 = vunpack.i.l.bf16 %v3167_v21  ;;  %v3174_v24 = vunpack.i.h.bf16 %v3172_v20  ;;  %v3173_v25 = vunpack.i.l.bf16 %v3172_v20  ;;  %3176 = vrot.lane.b32.xlu1 %v3167_v21, %s3451_s7 }
 0xc75   :  { %v2923_v26 = vpack.c.bf16 %v3169_v22, %v3168_v23  ;;  %v2926_v27 = vpack.c.bf16 %v3174_v24, %v3173_v25 }
 0xc76   :  { %v3182_v33 = vpop.permute.xlu0 %3181 }
 0xc77   :  { %2924 = vmatpush1.bf16.msra.mxu1 %v2923_v26  ;;  %3186 = vrot.lane.b32.xlu1 %v3167_v21, %s3452_s8  ;;  %v3184_v37 = vunpack.i.h.bf16 %v3182_v33  ;;  %v3183_v38 = vunpack.i.l.bf16 %v3182_v33 }
 0xc78   :  { %2925 = vmatprep.subr.bf16.mxu1 %v3445_v4 }
 0xc79   :  { %v2932_v43 = vpack.c.bf16 %v3184_v37, %v3183_v38 }
 0xc7a   :  { %v3192_v46 = vpop.permute.xlu0 %3191 }
 0xc7b   :  { %2927 = vmatpush1.bf16.msra.mxu1 %v2926_v27  ;;  %3196 = vrot.lane.b32.xlu1 %v3167_v21, %s3450_s6  ;;  %v3194_v47 = vunpack.i.h.bf16 %v3192_v46  ;;  %v3193_v48 = vunpack.i.l.bf16 %v3192_v46 }
 0xc7c   :  { %2928 = vmatprep.subr.bf16.mxu1 %v3445_v4 }
 0xc7d   :  { %v2938_v50 = vpack.c.bf16 %v3194_v47, %v3193_v48 }
 0xc7e   :  { %v3202_v53 = vpop.permute.xlu0 %3201 }
 0xc7f   :  { %3206 = vrot.lane.b32.xlu1 %v3167_v21, %s3453_s9  ;;  %v3204_v54 = vunpack.i.h.bf16 %v3202_v53  ;;  %v3203_v55 = vunpack.i.l.bf16 %v3202_v53 }
 0xc81   :  { %v2944_v58 = vpack.c.bf16 %v3204_v54, %v3203_v55 }
 0xc83   :  { %1044 = vperm.xlu1 %3104, %v856_v28  }
 0xc87   :  { %1054 = vperm.xlu1 %3104, %v858_v30  }
 0xc8b   :  { %1064 = vperm.xlu1 %3104, %v860_v31  }
 0xc8f   :  { %1074 = vperm.xlu1 %3104, %v862_v32   ;;  %v1040_v17 = vpop.permute.xlu0 %1039 }
 0xc93   :  { %v1050_v27 = vpop.permute.xlu0 %1049 }
 0xce5   :  { %v3177_v34 = vpop.permute.xlu1 %3176 }
 0xce6   :  { %v3179_v35 = vunpack.i.h.bf16 %v3177_v34  ;;  %v3178_v36 = vunpack.i.l.bf16 %v3177_v34 }
 0xce8   :  { %v2929_v39 = vpack.c.bf16 %v3179_v35, %v3178_v36 }
 0xce9   :  { %v3187_v41 = vpop.permute.xlu1 %3186 }
 0xcea   :  { %2930 = vmatpush1.bf16.msra.mxu1 %v2929_v39  ;;  %v3189_v44 = vunpack.i.h.bf16 %v3187_v41  ;;  %v3188_v45 = vunpack.i.l.bf16 %v3187_v41 }
 0xceb   :  { %2931 = vmatprep.subr.bf16.mxu1 %v3445_v4 }
 0xcec   :  { %v2935_v13 = vpack.c.bf16 %v3189_v44, %v3188_v45 }
 0xced   :  { %v3197_v49 = vpop.permute.xlu1 %3196 }
 0xcee   :  { %2933 = vmatpush1.bf16.msra.mxu1 %v2932_v43  ;;  %v3199_v51 = vunpack.i.h.bf16 %v3197_v49  ;;  %v3198_v52 = vunpack.i.l.bf16 %v3197_v49  ;;  %v1060_v43 = vpop.permute.xlu0 %1059 }
 0xcef   :  { %2934 = vmatprep.subr.bf16.mxu1 %v3445_v4 }
 0xcf0   :  { %v2941_v56 = vpack.c.bf16 %v3199_v51, %v3198_v52 }
 0xcf1   :  { %v3207_v57 = vpop.permute.xlu1 %3206 }
 0xcf2   :  { %2936 = vmatpush1.bf16.msra.mxu1 %v2935_v13  ;;  %v3209_v59 = vunpack.i.h.bf16 %v3207_v57  ;;  %v3208_v60 = vunpack.i.l.bf16 %v3207_v57 }
 0xcf3   :  { %2937 = vmatprep.subr.bf16.mxu1 %v3445_v4 }
 0xcf4   :  { %v2947_v61 = vpack.c.bf16 %v3209_v59, %v3208_v60 }
 0xcf6   :  { %2939 = vmatpush1.bf16.msra.mxu1 %v2938_v50 }
 0xcf7   :  { %2940 = vmatprep.subr.bf16.mxu1 %v3445_v4 }
 0xcfa   :  { %2942 = vmatpush1.bf16.msra.mxu1 %v2941_v56  ;;  %v1070_v56 = vpop.permute.xlu0 %1069 }
 0xcfb   :  { %2943 = vmatprep.subr.bf16.mxu1 %v3445_v4 }
 0xcfe   :  { %2945 = vmatpush1.bf16.msra.mxu1 %v2944_v58 }
 0xcff   :  { %2946 = vmatprep.subr.bf16.mxu1 %v3445_v4 }
 0xd02   :  { %2948 = vmatpush1.bf16.msra.mxu1 %v2947_v61  ;;  %v1045_v21 = vpop.permute.xlu1 %1044 }
 0xd03   :  { %2985 = vmatprep.subr.bf16.mxu1 %v3445_v4 }
 0xd05   :  { %1167 = vmatmul.mubr.f32.vlgmr.msra.gmra.mrb[8].mxu1 %v823_v62 }
 0xd06   :  { %2545 = vmatprep.mubr.msk.f32.mxu1 %vm1077_vm13, %v826_v63  ;;  %v1055_v35 = vpop.permute.xlu1 %1054 }
 0xd09   :  { %1172 = vmatmul.mubr.f32.gmra.mrb[10].mxu1 %v825_v0 }
 0xd0a   :  { %2546 = vmatprep.mubr.msk.f32.mxu1 %vm1077_vm13, %v828_v1  ;;  %v1065_v50 = vpop.permute.xlu1 %1064 }
 0xd0d   :  { %1177 = vmatmul.mubr.f32.gmra.mrb[12].mxu1 %v827_v2 }
 0xd0e   :  { %2547 = vmatprep.mubr.msk.f32.mxu1 %vm1077_vm13, %v830_v3  ;;  %v1075_v0 = vpop.permute.xlu1 %1074 }
 0xd11   :  { %1182 = vmatmul.mubr.f32.gmra.mrb[14].mxu1 %v829_v5 }
 0xd12   :  { %2548 = vmatprep.mubr.msk.f32.mxu1 %vm1077_vm13, %v832_v8 }
 0xd15   :  { %1187 = vmatmul.mubr.f32.gmra.mrb[16].mxu1 %v831_v9 }
 0xd16   :  { %2549 = vmatprep.mubr.msk.f32.mxu1 %vm1077_vm13, %v834_v10 }
 0xd19   :  { %1192 = vmatmul.mubr.f32.gmra.mrb[18].mxu1 %v833_v11 }
 0xd1a   :  { %2550 = vmatprep.mubr.msk.f32.mxu1 %vm1077_vm13, %v836_v12 }
 0xd1d   :  { %1197 = vmatmul.mubr.f32.gmra.mrb[20].mxu1 %v835_v40  ;;  %v889_v40 = vld [vmem:[#allocation5 + $0x460] sm:$0xff] }
 0xd1e   :  { %2551 = vmatprep.mubr.msk.f32.mxu1 %vm1077_vm13, %v838_v42  ;;  %v887_v42 = vld [vmem:[#allocation5 + $0x440] sm:$0xff] }
 0xd21   :  { %1202 = vmatmul.mubr.f32.gmra.mrb[22].mxu1 %v837_v16  ;;  %v872_v16 = vld [vmem:[#allocation5 + $0x3c8] sm:$0xff] }
 0xd22   :  { %2552 = vmatprep.mubr.msk.f32.mxu0 %vm1307_vm7, %v872_v16 }
 0xdd8   :  { %v1168_v18 = vpop.f32.mrb[8].mxu1 }
 0xdd9   :  { %v1169_v19 = vadd.f32 %v1168_v18, %v1040_v17  ;;  %v1170_v20 = vpop.f32.mrb[9].mxu1  ;;  %v890_v17 = vld [vmem:[#allocation5 + $0x470] sm:$0xff] }
 0xdda   :  { %v888_v18 = vld [vmem:[#allocation5 + $0x450] sm:$0xff] }
 0xddb   :  { %v1215_v23 = vmul.f32 0.01, %v1169_v19  ;;  %vm1207_vm14 = vcmp.gt.f32.partialorder %v1169_v19, 0.0 }
 0xddc   :  { %v1173_v22 = vpop.f32.mrb[10].mxu1 }
 0xddd   :  { %v1174_v24 = vadd.f32 %v1173_v22, %v1045_v21  ;;  %v1175_v25 = vpop.f32.mrb[11].mxu1  ;;  %v1223_v29 = vsel %vm1207_vm14, %v1169_v19, %v1215_v23 }
 0xddf   :  { %vm1208_vm15 = vcmp.gt.f32.partialorder %v1174_v24, 0.0  ;;  %v1216_v26 = vmul.f32 0.01, %v1174_v24 }
 0xde0   :  { %v1178_v28 = vpop.f32.mrb[12].mxu1 }
 0xde1   :  { %v1224_v30 = vsel %vm1208_vm15, %v1174_v24, %v1216_v26  ;;  %v1179_v31 = vadd.f32 %v1178_v28, %v1050_v27  ;;  %v1180_v32 = vpop.f32.mrb[13].mxu1 }
 0xde2   :  { %v2950_v33 = vpack.c.bf16 %v1224_v30, %v1223_v29  ;;  %v3210_v34 = vpack.i.bf16 %v1224_v30, %v1223_v29 }
 0xde3   :  { %v1217_v37 = vmul.f32 0.01, %v1179_v31  ;;  %vm1209_vm1 = vcmp.gt.f32.partialorder %v1179_v31, 0.0 }
 0xde4   :  { %v1183_v36 = vpop.f32.mrb[14].mxu1  ;;  %3211 = vrot.lane.b32.xlu0 %v3210_v34, %s3451_s7  ;;  %2951 = vmatpush1.bf16.msra.mxu0 %v2950_v33 }
 0xde5   :  { %v1184_v38 = vadd.f32 %v1183_v36, %v1055_v35  ;;  %v1185_v39 = vpop.f32.mrb[15].mxu1  ;;  %2952 = vmatprep.subr.bf16.mxu0 %v3445_v4  ;;  %v1225_v45 = vsel %vm1209_vm1, %v1179_v31, %v1217_v37 }
 0xde7   :  { %vm1210_vm2 = vcmp.gt.f32.partialorder %v1184_v38, 0.0  ;;  %v1218_v41 = vmul.f32 0.01, %v1184_v38 }
 0xde8   :  { %v1188_v44 = vpop.f32.mrb[16].mxu1 }
 0xde9   :  { %v1226_v46 = vsel %vm1210_vm2, %v1184_v38, %v1218_v41  ;;  %v1189_v47 = vadd.f32 %v1188_v44, %v1060_v43  ;;  %v1190_v48 = vpop.f32.mrb[17].mxu1 }
 0xdea   :  { %v2953_v13 = vpack.c.bf16 %v1226_v46, %v1225_v45  ;;  %v3215_v49 = vpack.i.bf16 %v1226_v46, %v1225_v45 }
 0xdeb   :  { %v1219_v52 = vmul.f32 0.01, %v1189_v47  ;;  %vm1211_vm3 = vcmp.gt.f32.partialorder %v1189_v47, 0.0 }
 0xdec   :  { %v1193_v51 = vpop.f32.mrb[18].mxu1  ;;  %3216 = vrot.lane.b32.xlu1 %v3215_v49, %s3451_s7  ;;  %2954 = vmatpush1.bf16.msra.mxu0 %v2953_v13 }
 0xded   :  { %v1194_v53 = vadd.f32 %v1193_v51, %v1065_v50  ;;  %v1195_v54 = vpop.f32.mrb[19].mxu1  ;;  %2955 = vmatprep.subr.bf16.mxu0 %v3445_v4  ;;  %v1227_v58 = vsel %vm1211_vm3, %v1189_v47, %v1219_v52  ;;  %v871_v52 = vld [vmem:[#allocation5 + $0x3c0] sm:$0xff] }
 0xdee   :  { %v873_v54 = vld [vmem:[#allocation5 + $0x3d0] sm:$0xff] }
 0xdef   :  { %vm1212_vm4 = vcmp.gt.f32.partialorder %v1194_v53, 0.0  ;;  %v1220_v55 = vmul.f32 0.01, %v1194_v53 }
 0xdf0   :  { %v1198_v57 = vpop.f32.mrb[20].mxu1 }
 0xdf1   :  { %v1228_v59 = vsel %vm1212_vm4, %v1194_v53, %v1220_v55  ;;  %v1199_v60 = vadd.f32 %v1198_v57, %v1070_v56  ;;  %v1200_v61 = vpop.f32.mrb[21].mxu1  ;;  %v874_v53 = vld [vmem:[#allocation5 + $0x3d8] sm:$0xff]  ;;  %v876_v55 = vld [vmem:[#allocation5 + $0x3e8] sm:$0xff]  ;;  %v875_v56 = vld [vmem:[#allocation5 + $0x3e0] sm:$0xff] }
 0xdf2   :  { %v2956_v62 = vpack.c.bf16 %v1228_v59, %v1227_v58  ;;  %v3220_v63 = vpack.i.bf16 %v1228_v59, %v1227_v58  ;;  %v878_v57 = vld [vmem:[#allocation5 + $0x3f8] sm:$0xff]  ;;  %v877_v58 = vld [vmem:[#allocation5 + $0x3f0] sm:$0xff] }
 0xdf3   :  { %v1221_v2 = vmul.f32 0.01, %v1199_v60  ;;  %vm1213_vm5 = vcmp.gt.f32.partialorder %v1199_v60, 0.0 }
 0xdf4   :  { %v1203_v1 = vpop.f32.mrb[22].mxu1  ;;  %3221 = vrot.lane.b32.xlu0 %v3220_v63, %s3451_s7  ;;  %2957 = vmatpush1.bf16.msra.mxu0 %v2956_v62 }
 0xdf5   :  { %v1204_v3 = vadd.f32 %v1203_v1, %v1075_v0  ;;  %v1205_v5 = vpop.f32.mrb[23].mxu1  ;;  %2958 = vmatprep.subr.bf16.mxu0 %v3445_v4  ;;  %v1229_v9 = vsel %vm1213_vm5, %v1199_v60, %v1221_v2  ;;  %vm2509_vm5 = vcmask 58368  }
 0xdf7   :  { %vm1214_vm6 = vcmp.gt.f32.partialorder %v1204_v3, 0.0  ;;  %v1222_v8 = vmul.f32 0.01, %v1204_v3 }
 0xdf8   :  { %3231 = vrot.lane.b32.xlu0 %v3210_v34, %s3452_s8 }
 0xdf9   :  { %v1230_v10 = vsel %vm1214_vm6, %v1204_v3, %v1222_v8 }
 0xdfa   :  { %v2959_v11 = vpack.c.bf16 %v1230_v10, %v1229_v9  ;;  %v3225_v12 = vpack.i.bf16 %v1230_v10, %v1229_v9 }
 0xdfc   :  { %3226 = vrot.lane.b32.xlu1 %v3225_v12, %s3451_s7  ;;  %3241 = vrot.lane.b32.xlu0 %v3220_v63, %s3452_s8 }
 0xdfd   :  { %2960 = vmatpush1.bf16.msra.mxu0 %v2959_v11 }
 0xdfe   :  { %2961 = vmatprep.subr.bf16.mxu0 %v3445_v4 }
 0xe00   :  { %3236 = vrot.lane.b32.xlu1 %v3215_v49, %s3452_s8  ;;  %1299 = vperm.xlu0 %3103, %v889_v40  }
 0xe04   :  { %3246 = vrot.lane.b32.xlu1 %v3225_v12, %s3452_s8  ;;  %1289 = vperm.xlu0 %3103, %v887_v42  }
 0xe08   :  { %1304 = vperm.xlu1 %3104, %v890_v17  }
 0xe0c   :  { %1294 = vperm.xlu1 %3104, %v888_v18  }
 0xe56   :  { %v3212_v19 = vpop.permute.xlu0 %3211 }
 0xe57   :  { %v3214_v20 = vunpack.i.h.bf16 %v3212_v19  ;;  %v3213_v21 = vunpack.i.l.bf16 %v3212_v19 }
 0xe59   :  { %v2962_v22 = vpack.c.bf16 %v3214_v20, %v3213_v21 }
 0xe5b   :  { %2963 = vmatpush1.bf16.msra.mxu0 %v2962_v22 }
 0xe5c   :  { %2964 = vmatprep.subr.bf16.mxu0 %v3445_v4 }
 0xe5e   :  { %v3217_v23 = vpop.permute.xlu1 %3216 }
 0xe5f   :  { %v3219_v24 = vunpack.i.h.bf16 %v3217_v23  ;;  %v3218_v25 = vunpack.i.l.bf16 %v3217_v23 }
 0xe61   :  { %v2965_v26 = vpack.c.bf16 %v3219_v24, %v3218_v25 }
 0xe63   :  { %2966 = vmatpush1.bf16.msra.mxu0 %v2965_v26 }
 0xe64   :  { %2967 = vmatprep.subr.bf16.mxu0 %v3445_v4 }
 0xe66   :  { %v3222_v27 = vpop.permute.xlu0 %3221 }
 0xe67   :  { %v3224_v28 = vunpack.i.h.bf16 %v3222_v27  ;;  %v3223_v29 = vunpack.i.l.bf16 %v3222_v27  ;;  %v896_v27 = vld [vmem:[#allocation5 + $0x4d0] sm:$0xf] }
 0xe69   :  { %v2968_v30 = vpack.c.bf16 %v3224_v28, %v3223_v29 }
 0xe6a   :  { %v3232_v31 = vpop.permute.xlu0 %3231 }
 0xe6b   :  { %2969 = vmatpush1.bf16.msra.mxu0 %v2968_v30  ;;  %v3234_v35 = vunpack.i.h.bf16 %v3232_v31  ;;  %v3233_v36 = vunpack.i.l.bf16 %v3232_v31 }
 0xe6c   :  { %2970 = vmatprep.subr.bf16.mxu0 %v3445_v4 }
 0xe6d   :  { %v2974_v39 = vpack.c.bf16 %v3234_v35, %v3233_v36 }
 0xe6e   :  { %v3227_v32 = vpop.permute.xlu1 %3226  ;;  %v3242_v44 = vpop.permute.xlu0 %3241 }
 0xe6f   :  { %v3229_v33 = vunpack.i.h.bf16 %v3227_v32  ;;  %v3228_v34 = vunpack.i.l.bf16 %v3227_v32  ;;  %v3244_v45 = vunpack.i.h.bf16 %v3242_v44  ;;  %v3243_v46 = vunpack.i.l.bf16 %v3242_v44 }
 0xe71   :  { %v2971_v37 = vpack.c.bf16 %v3229_v33, %v3228_v34  ;;  %v2980_v13 = vpack.c.bf16 %v3244_v45, %v3243_v46  ;;  %v863_v46 = vld [vmem:[#allocation5 + $0x340] sm:$0xff] }
 0xe72   :  { %v3237_v38 = vpop.permute.xlu1 %3236 }
 0xe73   :  { %2972 = vmatpush1.bf16.msra.mxu0 %v2971_v37  ;;  %v3239_v41 = vunpack.i.h.bf16 %v3237_v38  ;;  %v3238_v43 = vunpack.i.l.bf16 %v3237_v38 }
 0xe74   :  { %2973 = vmatprep.subr.bf16.mxu0 %v3445_v4 }
 0xe75   :  { %v2977_v47 = vpack.c.bf16 %v3239_v41, %v3238_v43 }
 0xe76   :  { %v3247_v48 = vpop.permute.xlu1 %3246 }
 0xe77   :  { %2975 = vmatpush1.bf16.msra.mxu0 %v2974_v39  ;;  %v3249_v49 = vunpack.i.h.bf16 %v3247_v48  ;;  %v3248_v50 = vunpack.i.l.bf16 %v3247_v48  ;;  %v867_v48 = vld [vmem:[#allocation5 + $0x380] sm:$0xff] }
 0xe78   :  { %2976 = vmatprep.subr.bf16.mxu0 %v3445_v4 }
 0xe79   :  { %v2983_v51 = vpack.c.bf16 %v3249_v49, %v3248_v50 }
 0xe7b   :  { %2978 = vmatpush1.bf16.msra.mxu0 %v2977_v47  ;;  %v865_v47 = vld [vmem:[#allocation5 + $0x360] sm:$0xff] }
 0xe7c   :  { %2979 = vmatprep.subr.bf16.mxu0 %v3445_v4 }
 0xe7f   :  { %2981 = vmatpush1.bf16.msra.mxu0 %v2980_v13  ;;  %v1300_v59 = vpop.permute.xlu0 %1299  ;;  %v869_v13 = vld [vmem:[#allocation5 + $0x3a0] sm:$0xff] }
 0xe80   :  { %2982 = vmatprep.subr.bf16.mxu0 %v3445_v4 }
 0xe83   :  { %2984 = vmatpush1.bf16.msra.mxu0 %v2983_v51  ;;  %v1290_v0 = vpop.permute.xlu0 %1289 }
 0xe84   :  { %2790 = vmatprep.subr.msk.mxu0 %vm1462_vm9, %v896_v27 }
 0xe86   :  { %1385 = vmatmul.mubr.f32.vlgmr.msra.gmra.mrb[10].mxu0 %v871_v52 }
 0xe87   :  { %2553 = vmatprep.mubr.msk.f32.mxu0 %vm1307_vm7, %v874_v53  ;;  %v1305_v62 = vpop.permute.xlu1 %1304  ;;  %2791 = vmatpush3.msk.msra.mxu0 %vm1462_vm9, %v896_v27 }
 0xe88   :  { %3015 = vmatprep.subr.bf16.mxu0 %v3445_v4 }
 0xe8a   :  { %1390 = vmatmul.mubr.f32.gmra.mrb[12].mxu0 %v873_v54 }
 0xe8b   :  { %2554 = vmatprep.mubr.msk.f32.mxu0 %vm1307_vm7, %v876_v55  ;;  %v1295_v5 = vpop.permute.xlu1 %1294 }
 0xe8e   :  { %1395 = vmatmul.mubr.f32.gmra.mrb[14].mxu0 %v875_v56 }
 0xe8f   :  { %2555 = vmatprep.mubr.msk.f32.mxu0 %vm1307_vm7, %v878_v57  ;;  %v864_v57 = vld [vmem:[#allocation5 + $0x350] sm:$0xff] }
 0xe92   :  { %1400 = vmatmul.mubr.f32.gmra.mrb[16].mxu0 %v877_v58  ;;  %v840_v58 = vld [vmem:[#allocation5 + $0x248] sm:$0xff] }
 0xe93   :  { %2561 = vmatprep.mubr.msk.f32.mxu1 %vm1077_vm13, %v840_v58 }
 0xf59   :  { %v1386_v60 = vpop.f32.mrb[10].mxu0 }
 0xf5a   :  { %v1388_v61 = vpop.f32.mrb[11].mxu0  ;;  %v1387_v2 = vadd.f32 %v1386_v60, %v1290_v0  ;;  %v868_v60 = vld [vmem:[#allocation5 + $0x390] sm:$0xff] }
 0xf5b   :  { %v870_v61 = vld [vmem:[#allocation5 + $0x3b0] sm:$0xff] }
 0xf5c   :  { %3344 = vtanh.f32 %v1387_v2 }
 0xf5d   :  { %v1391_v63 = vpop.f32.mrb[12].mxu0 }
 0xf5e   :  { %v1393_v1 = vpop.f32.mrb[13].mxu0  ;;  %v1392_v10 = vadd.f32 %v1391_v63, %v1295_v5 }
 0xf61   :  { %v1396_v3 = vpop.f32.mrb[14].mxu0 }
 0xf62   :  { %v1397_v8 = vadd.f32 %v1396_v3, %v1300_v59  ;;  %v1398_v9 = vpop.f32.mrb[15].mxu0  ;;  %v866_v59 = vld [vmem:[#allocation5 + $0x370] sm:$0xff] }
 0xf64   :  { %3346 = vtanh.f32 %v1397_v8 }
 0xf65   :  { %v1401_v11 = vpop.f32.mrb[16].mxu0  ;;  %3348 = vtanh.f32 %v1392_v10 }
 0xf66   :  { %v1402_v12 = vadd.f32 %v1401_v11, %v1305_v62  ;;  %v1403_v40 = vpop.f32.mrb[17].mxu0  ;;  %v3345_v42 = vpop.eup %3344 }
 0xf67   :  { %v1409_v18 = vmul.f32 1.442695, %v3345_v42 }
 0xf68   :  { %3350 = vtanh.f32 %v1402_v12 }
 0xf6e   :  { %v3347_v16 = vpop.eup %3346 }
 0xf6f   :  { %v1423_v17 = vmul.f32 1.442695, %v3347_v16  ;;  %v3349_v19 = vpop.eup %3348 }
 0xf70   :  { %v1411_v22 = vmul.f32 1.442695, %v3349_v19 }
 0xf71   :  { %3352 = vpow2.f32 %v1423_v17 }
 0xf72   :  { %v3351_v20 = vpop.eup %3350  ;;  %3354 = vpow2.f32 %v1409_v18 }
 0xf73   :  { %v1425_v21 = vmul.f32 1.442695, %v3351_v20 }
 0xf75   :  { %3356 = vpow2.f32 %v1425_v21 }
 0xf76   :  { %3358 = vpow2.f32 %v1411_v22 }
 0xf7b   :  { %v3353_v23 = vpop.eup %3352 }
 0xf7c   :  { %1429 = vrot.lane.b32.xlu0 %v3353_v23, %s3454_s10  ;;  %v3355_v24 = vpop.eup %3354 }
 0xf7f   :  { %v3357_v25 = vpop.eup %3356 }
 0xf80   :  { %1431 = vrot.lane.b32.xlu1 %v3357_v25, %s3454_s10  ;;  %1415 = vrot.lane.b32.xlu0 %v3355_v24, %s3459_s15  ;;  %v3359_v26 = vpop.eup %3358 }
 0xf84   :  { %1417 = vrot.lane.b32.xlu1 %v3359_v26, %s3459_s15 }
 0xfee   :  { %v1430_v28 = vpop.permute.xlu0 %1429 }
 0xfef   :  { %v3637_v29 = vmul.f32 %v1430_v28, %v3573_v15 }
 0xff1   :  { %1439 = vrot.lane.b32.xlu0 %v3637_v29, %s3460_s16 }
 0xff2   :  { %v1432_v30 = vpop.permute.xlu1 %1431  ;;  %v1416_v31 = vpop.permute.xlu0 %1415 }
 0xff3   :  { %v3641_v32 = vmul.f32 %v3571_v14, %v1432_v30  ;;  %v3644_v33 = vmul.f32 %v1416_v31, %v3573_v15  ;;  %v839_v31 = vld [vmem:[#allocation5 + $0x240] sm:$0xff] }
 0xff5   :  { %1441 = vrot.lane.b32.xlu1 %v3641_v32, %s3460_s16  ;;  %1445 = vrot.lane.b32.xlu0 %v3644_v33, %s3461_s17 }
 0xff6   :  { %v1418_v34 = vpop.permute.xlu1 %1417 }
 0xff7   :  { %v3649_v35 = vmul.f32 %v3571_v14, %v1418_v34  ;;  %v842_v34 = vld [vmem:[#allocation5 + $0x258] sm:$0xff] }
 0xff9   :  { %1447 = vrot.lane.b32.xlu1 %v3649_v35, %s3461_s17 }
0x1063   :  { %v1440_v36 = vpop.permute.xlu0 %1439 }
0x1064   :  { %1449 = vrot.lane.b32.xlu0 %v1440_v36, %s3461_s17  ;;  %v841_v36 = vld [vmem:[#allocation5 + $0x250] sm:$0xff] }
0x1067   :  { %v1442_v37 = vpop.permute.xlu1 %1441  ;;  %v1446_v38 = vpop.permute.xlu0 %1445 }
0x1068   :  { %1451 = vrot.lane.b32.xlu1 %v1442_v37, %s3461_s17  ;;  %2792 = vmatprep.mubr.msk.f32.mxu0 %vm1453_vm10, %v1446_v38  ;;  %v844_v37 = vld [vmem:[#allocation5 + $0x268] sm:$0xff]  ;;  %v843_v38 = vld [vmem:[#allocation5 + $0x260] sm:$0xff] }
0x106b   :  { %v1448_v15 = vpop.permute.xlu1 %1447 }
0x106c   :  { %2793 = vmatmul.mubr.msk.f32.vlgmr.msra.gmra.mrb[18].mxu0 %vm1453_vm10, %v1448_v15  ;;  %v846_v15 = vld [vmem:[#allocation5 + $0x278] sm:$0xff] }
0x10d6   :  { %v1450_v39 = vpop.permute.xlu0 %1449 }
0x10d7   :  { %2795 = vmatprep.mubr.msk.f32.mxu0 %vm1453_vm10, %v1450_v39  ;;  %v845_v39 = vld [vmem:[#allocation5 + $0x270] sm:$0xff] }
0x10da   :  { %v1452_v41 = vpop.permute.xlu1 %1451 }
0x10db   :  { %2796 = vmatmul.mubr.msk.f32.gmra.mrb[20].mxu0 %vm1453_vm10, %v1452_v41  ;;  %v848_v41 = vld [vmem:[#allocation5 + $0x288] sm:$0xff] }
0x113f   :  { %v2794_v14 = vpop.f32.mrb[18].mxu0 }
0x1140   :  { %v1532_v43 = vpop.f32.mrb[19].mxu0 }
0x1141   :  { %v3250_v44 = vpack.i.bf16 %v2794_v14, %v1532_v43  ;;  %v2986_v45 = vpack.c.bf16 %v2794_v14, %v1532_v43  ;;  %v847_v14 = vld [vmem:[#allocation5 + $0x280] sm:$0xff]  ;;  %v850_v43 = vld [vmem:[#allocation5 + $0x298] sm:$0xff] }
0x1143   :  { %3251 = vrot.lane.b32.xlu0 %v3250_v44, %s3451_s7  ;;  %2987 = vmatpush1.bf16.msra.mxu1 %v2986_v45  ;;  %v852_v45 = vld [vmem:[#allocation5 + $0x2a8] sm:$0xff] }
0x1144   :  { %2988 = vmatprep.subr.bf16.mxu1 %v3445_v4 }
0x1147   :  { %3261 = vrot.lane.b32.xlu0 %v3250_v44, %s3452_s8 }
0x114b   :  { %3271 = vrot.lane.b32.xlu0 %v3250_v44, %s3450_s6 }
0x114f   :  { %3281 = vrot.lane.b32.xlu0 %v3250_v44, %s3453_s9  ;;  %v849_v44 = vld [vmem:[#allocation5 + $0x290] sm:$0xff] }
0x1153   :  { %1605 = vperm.xlu0 %3103, %v863_v46   ;;  %v851_v46 = vld [vmem:[#allocation5 + $0x2a0] sm:$0xff] }
0x1157   :  { %1615 = vperm.xlu0 %3103, %v865_v47   ;;  %v854_v47 = vld [vmem:[#allocation5 + $0x2b8] sm:$0xff] }
0x115b   :  { %1625 = vperm.xlu0 %3103, %v867_v48   ;;  %v853_v48 = vld [vmem:[#allocation5 + $0x2b0] sm:$0xff] }
0x115f   :  { %1635 = vperm.xlu0 %3103, %v869_v13  }
0x11ae   :  { %v2797_v49 = vpop.f32.mrb[20].mxu0 }
0x11af   :  { %v1542_v50 = vpop.f32.mrb[21].mxu0 }
0x11b0   :  { %v3255_v51 = vpack.i.bf16 %v2797_v49, %v1542_v50  ;;  %v2989_v52 = vpack.c.bf16 %v2797_v49, %v1542_v50 }
0x11b2   :  { %3256 = vrot.lane.b32.xlu1 %v3255_v51, %s3451_s7  ;;  %2990 = vmatpush1.bf16.msra.mxu1 %v2989_v52 }
0x11b3   :  { %2991 = vmatprep.subr.bf16.mxu1 %v3445_v4 }
0x11b5   :  { %v3252_v53 = vpop.permute.xlu0 %3251 }
0x11b6   :  { %v3254_v54 = vunpack.i.h.bf16 %v3252_v53  ;;  %v3253_v55 = vunpack.i.l.bf16 %v3252_v53  ;;  %3266 = vrot.lane.b32.xlu1 %v3255_v51, %s3452_s8 }
0x11b8   :  { %v2992_v56 = vpack.c.bf16 %v3254_v54, %v3253_v55 }
0x11b9   :  { %v3262_v62 = vpop.permute.xlu0 %3261 }
0x11ba   :  { %3276 = vrot.lane.b32.xlu1 %v3255_v51, %s3450_s6  ;;  %2993 = vmatpush1.bf16.msra.mxu1 %v2992_v56  ;;  %v3264_v2 = vunpack.i.h.bf16 %v3262_v62  ;;  %v3263_v3 = vunpack.i.l.bf16 %v3262_v62 }
0x11bb   :  { %2994 = vmatprep.subr.bf16.mxu1 %v3445_v4 }
0x11bc   :  { %v2998_v9 = vpack.c.bf16 %v3264_v2, %v3263_v3 }
0x11bd   :  { %v3272_v12 = vpop.permute.xlu0 %3271 }
0x11be   :  { %3286 = vrot.lane.b32.xlu1 %v3255_v51, %s3453_s9  ;;  %v3274_v40 = vunpack.i.h.bf16 %v3272_v12  ;;  %v3273_v42 = vunpack.i.l.bf16 %v3272_v12 }
0x11c0   :  { %v3004_v18 = vpack.c.bf16 %v3274_v40, %v3273_v42 }
0x11c1   :  { %v3282_v21 = vpop.permute.xlu0 %3281 }
0x11c2   :  { %1610 = vperm.xlu1 %3104, %v864_v57   ;;  %v3284_v22 = vunpack.i.h.bf16 %v3282_v21  ;;  %v3283_v23 = vunpack.i.l.bf16 %v3282_v21 }
0x11c4   :  { %v3010_v26 = vpack.c.bf16 %v3284_v22, %v3283_v23 }
0x11c6   :  { %1620 = vperm.xlu1 %3104, %v866_v59  }
0x11ca   :  { %1630 = vperm.xlu1 %3104, %v868_v60  }
0x11ce   :  { %1640 = vperm.xlu1 %3104, %v870_v61  }
0x11d2   :  { %v1606_v13 = vpop.permute.xlu0 %1605 }
0x11d6   :  { %v1616_v58 = vpop.permute.xlu0 %1615 }
0x1224   :  { %v3257_v63 = vpop.permute.xlu1 %3256 }
0x1225   :  { %v3259_v0 = vunpack.i.h.bf16 %v3257_v63  ;;  %v3258_v1 = vunpack.i.l.bf16 %v3257_v63 }
0x1227   :  { %v2995_v5 = vpack.c.bf16 %v3259_v0, %v3258_v1 }
0x1228   :  { %v3267_v8 = vpop.permute.xlu1 %3266 }
0x1229   :  { %2996 = vmatpush1.bf16.msra.mxu1 %v2995_v5  ;;  %v3269_v10 = vunpack.i.h.bf16 %v3267_v8  ;;  %v3268_v11 = vunpack.i.l.bf16 %v3267_v8 }
0x122a   :  { %2997 = vmatprep.subr.bf16.mxu1 %v3445_v4 }
0x122b   :  { %v3001_v16 = vpack.c.bf16 %v3269_v10, %v3268_v11  ;;  %v1626_v11 = vpop.permute.xlu0 %1625 }
0x122c   :  { %v3277_v17 = vpop.permute.xlu1 %3276 }
0x122d   :  { %2999 = vmatpush1.bf16.msra.mxu1 %v2998_v9  ;;  %v3279_v19 = vunpack.i.h.bf16 %v3277_v17  ;;  %v3278_v20 = vunpack.i.l.bf16 %v3277_v17 }
0x122e   :  { %3000 = vmatprep.subr.bf16.mxu1 %v3445_v4 }
0x122f   :  { %v3007_v24 = vpack.c.bf16 %v3279_v19, %v3278_v20 }
0x1230   :  { %v3287_v25 = vpop.permute.xlu1 %3286 }
0x1231   :  { %3002 = vmatpush1.bf16.msra.mxu1 %v3001_v16  ;;  %v3289_v27 = vunpack.i.h.bf16 %v3287_v25  ;;  %v3288_v28 = vunpack.i.l.bf16 %v3287_v25 }
0x1232   :  { %3003 = vmatprep.subr.bf16.mxu1 %v3445_v4 }
0x1233   :  { %v3013_v30 = vpack.c.bf16 %v3289_v27, %v3288_v28 }
0x1235   :  { %3005 = vmatpush1.bf16.msra.mxu1 %v3004_v18 }
0x1236   :  { %3006 = vmatprep.subr.bf16.mxu1 %v3445_v4 }
0x1239   :  { %3008 = vmatpush1.bf16.msra.mxu1 %v3007_v24 }
0x123a   :  { %3009 = vmatprep.subr.bf16.mxu1 %v3445_v4 }
0x123d   :  { %3011 = vmatpush1.bf16.msra.mxu1 %v3010_v26  ;;  %v1636_v26 = vpop.permute.xlu0 %1635 }
0x123e   :  { %3012 = vmatprep.subr.bf16.mxu1 %v3445_v4 }
0x1241   :  { %3014 = vmatpush1.bf16.msra.mxu1 %v3013_v30  ;;  %v1611_v52 = vpop.permute.xlu1 %1610 }
0x1242   :  { %2798 = vmatprep.subr.mxu1 %v3448_v7 }
0x1244   :  { %1732 = vmatmul.mubr.f32.vlgmr.msra.gmra.mrb[24].mxu1 %v839_v31 }
0x1245   :  { %2562 = vmatprep.mubr.msk.f32.mxu1 %vm1077_vm13, %v842_v34  ;;  %v1621_v2 = vpop.permute.xlu1 %1620 }
0x1248   :  { %1737 = vmatmul.mubr.f32.gmra.mrb[26].mxu1 %v841_v36 }
0x1249   :  { %2563 = vmatprep.mubr.msk.f32.mxu1 %vm1077_vm13, %v844_v37  ;;  %v1631_v20 = vpop.permute.xlu1 %1630 }
0x124c   :  { %1742 = vmatmul.mubr.f32.gmra.mrb[28].mxu1 %v843_v38 }
0x124d   :  { %2564 = vmatprep.mubr.msk.f32.mxu1 %vm1077_vm13, %v846_v15  ;;  %v1641_v38 = vpop.permute.xlu1 %1640 }
0x1250   :  { %1747 = vmatmul.mubr.f32.gmra.mrb[30].mxu1 %v845_v39 }
0x1251   :  { %2565 = vmatprep.mubr.msk.f32.mxu1 %vm1077_vm13, %v848_v41 }
0x1254   :  { %1752 = vmatmul.mubr.f32.gmra.mrb[32].mxu1 %v847_v14 }
0x1255   :  { %2566 = vmatprep.mubr.msk.f32.mxu1 %vm1077_vm13, %v850_v43 }
0x1258   :  { %1757 = vmatmul.mubr.f32.gmra.mrb[34].mxu1 %v849_v44 }
0x1259   :  { %2567 = vmatprep.mubr.msk.f32.mxu1 %vm1077_vm13, %v852_v45 }
0x125c   :  { %1762 = vmatmul.mubr.f32.gmra.mrb[36].mxu1 %v851_v46 }
0x125d   :  { %2568 = vmatprep.mubr.msk.f32.mxu1 %vm1077_vm13, %v854_v47 }
0x1260   :  { %1767 = vmatmul.mubr.f32.gmra.mrb[38].mxu1 %v853_v48  ;;  %v893_v48 = vld [vmem:[#allocation5 + $0x4a0] sm:$0xff] }
0x1261   :  { %2800 = vmatprep.mubr.msk.f32.mxu1 %vm3447_vm0, %v3448_v7 }
0x1317   :  { %v1733_v49 = vpop.f32.mrb[24].mxu1 }
0x1318   :  { %v1734_v50 = vadd.f32 %v1733_v49, %v1606_v13  ;;  %v1735_v51 = vpop.f32.mrb[25].mxu1  ;;  %v892_v13 = vld [vmem:[#allocation5 + $0x490] sm:$0xff]  ;;  %v880_v49 = vld [vmem:[#allocation5 + $0x408] sm:$0xff] }
0x1319   :  { %2569 = vmatprep.mubr.msk.f32.mxu0 %vm1307_vm7, %v880_v49  ;;  %v891_v51 = vld [vmem:[#allocation5 + $0x480] sm:$0xff] }
0x131a   :  { %v1780_v54 = vmul.f32 0.01, %v1734_v50  ;;  %vm1772_vm11 = vcmp.gt.f32.partialorder %v1734_v50, 0.0 }
0x131b   :  { %v1738_v53 = vpop.f32.mrb[26].mxu1 }
0x131c   :  { %v1739_v55 = vadd.f32 %v1738_v53, %v1611_v52  ;;  %v1740_v56 = vpop.f32.mrb[27].mxu1  ;;  %v1788_v60 = vsel %vm1772_vm11, %v1734_v50, %v1780_v54  ;;  %v894_v50 = vld [vmem:[#allocation5 + $0x4b0] sm:$0xff] }
0x131e   :  { %vm1773_vm12 = vcmp.gt.f32.partialorder %v1739_v55, 0.0  ;;  %v1781_v57 = vmul.f32 0.01, %v1739_v55 }
0x131f   :  { %v1743_v59 = vpop.f32.mrb[28].mxu1 }
0x1320   :  { %v1789_v61 = vsel %vm1773_vm12, %v1739_v55, %v1781_v57  ;;  %v1744_v62 = vadd.f32 %v1743_v59, %v1616_v58  ;;  %v1745_v63 = vpop.f32.mrb[29].mxu1 }
0x1321   :  { %v3310_v0 = vpack.i.bf16 %v1789_v61, %v1788_v60  ;;  %v3016_v1 = vpack.c.bf16 %v1789_v61, %v1788_v60 }
0x1322   :  { %v1782_v5 = vmul.f32 0.01, %v1744_v62  ;;  %vm1774_vm13 = vcmp.gt.f32.partialorder %v1744_v62, 0.0 }
0x1323   :  { %v1748_v3 = vpop.f32.mrb[30].mxu1  ;;  %3291 = vrot.lane.b32.xlu0 %v3310_v0, %s3451_s7  ;;  %3017 = vmatpush1.bf16.msra.mxu0 %v3016_v1 }
0x1324   :  { %v1749_v8 = vadd.f32 %v1748_v3, %v1621_v2  ;;  %v1750_v9 = vpop.f32.mrb[31].mxu1  ;;  %3018 = vmatprep.subr.bf16.mxu0 %v3445_v4  ;;  %v1790_v40 = vsel %vm1774_vm13, %v1744_v62, %v1782_v5 }
0x1326   :  { %vm1775_vm14 = vcmp.gt.f32.partialorder %v1749_v8, 0.0  ;;  %v1783_v10 = vmul.f32 0.01, %v1749_v8 }
0x1327   :  { %v1753_v12 = vpop.f32.mrb[32].mxu1 }
0x1328   :  { %v1791_v42 = vsel %vm1775_vm14, %v1749_v8, %v1783_v10  ;;  %v1754_v16 = vadd.f32 %v1753_v12, %v1626_v11  ;;  %v1755_v17 = vpop.f32.mrb[33].mxu1 }
0x1329   :  { %v3315_v18 = vpack.i.bf16 %v1791_v42, %v1790_v40  ;;  %v3019_v19 = vpack.c.bf16 %v1791_v42, %v1790_v40 }
0x132a   :  { %v1784_v22 = vmul.f32 0.01, %v1754_v16  ;;  %vm1776_vm15 = vcmp.gt.f32.partialorder %v1754_v16, 0.0 }
0x132b   :  { %v1758_v21 = vpop.f32.mrb[34].mxu1  ;;  %3296 = vrot.lane.b32.xlu1 %v3315_v18, %s3451_s7  ;;  %3020 = vmatpush1.bf16.msra.mxu0 %v3019_v19 }
0x132c   :  { %v1759_v23 = vadd.f32 %v1758_v21, %v1631_v20  ;;  %v1760_v24 = vpop.f32.mrb[35].mxu1  ;;  %3021 = vmatprep.subr.bf16.mxu0 %v3445_v4  ;;  %v1792_v28 = vsel %vm1776_vm15, %v1754_v16, %v1784_v22 }
0x132d   :  { %v882_v24 = vld [vmem:[#allocation5 + $0x418] sm:$0xff] }
0x132e   :  { %vm1777_vm1 = vcmp.gt.f32.partialorder %v1759_v23, 0.0  ;;  %v1785_v25 = vmul.f32 0.01, %v1759_v23 }
0x132f   :  { %v1763_v27 = vpop.f32.mrb[36].mxu1 }
0x1330   :  { %v1793_v30 = vsel %vm1777_vm1, %v1759_v23, %v1785_v25  ;;  %v1764_v31 = vadd.f32 %v1763_v27, %v1636_v26  ;;  %v1765_v34 = vpop.f32.mrb[37].mxu1  ;;  %v879_v23 = vld [vmem:[#allocation5 + $0x400] sm:$0xff]  ;;  %v881_v25 = vld [vmem:[#allocation5 + $0x410] sm:$0xff]  ;;  %v884_v26 = vld [vmem:[#allocation5 + $0x428] sm:$0xff] }
0x1331   :  { %v3320_v36 = vpack.i.bf16 %v1793_v30, %v1792_v28  ;;  %v3022_v37 = vpack.c.bf16 %v1793_v30, %v1792_v28  ;;  %v883_v27 = vld [vmem:[#allocation5 + $0x420] sm:$0xff]  ;;  %v886_v28 = vld [vmem:[#allocation5 + $0x438] sm:$0xff] }
0x1332   :  { %v1786_v39 = vmul.f32 0.01, %v1764_v31  ;;  %vm1778_vm2 = vcmp.gt.f32.partialorder %v1764_v31, 0.0 }
0x1333   :  { %v1768_v15 = vpop.f32.mrb[38].mxu1  ;;  %3301 = vrot.lane.b32.xlu0 %v3320_v36, %s3451_s7  ;;  %3023 = vmatpush1.bf16.msra.mxu0 %v3022_v37 }
0x1334   :  { %v1769_v41 = vadd.f32 %v1768_v15, %v1641_v38  ;;  %v1770_v14 = vpop.f32.mrb[39].mxu1  ;;  %3024 = vmatprep.subr.bf16.mxu0 %v3445_v4  ;;  %v1794_v44 = vsel %vm1778_vm2, %v1764_v31, %v1786_v39 }
0x1336   :  { %vm1779_vm3 = vcmp.gt.f32.partialorder %v1769_v41, 0.0  ;;  %v1787_v43 = vmul.f32 0.01, %v1769_v41 }
0x1337   :  { %3311 = vrot.lane.b32.xlu0 %v3310_v0, %s3452_s8 }
0x1338   :  { %v1795_v45 = vsel %vm1779_vm3, %v1769_v41, %v1787_v43 }
0x1339   :  { %v3325_v46 = vpack.i.bf16 %v1795_v45, %v1794_v44  ;;  %v3025_v47 = vpack.c.bf16 %v1795_v45, %v1794_v44 }
0x133b   :  { %3306 = vrot.lane.b32.xlu1 %v3325_v46, %s3451_s7  ;;  %3321 = vrot.lane.b32.xlu0 %v3320_v36, %s3452_s8 }
0x133c   :  { %3026 = vmatpush1.bf16.msra.mxu0 %v3025_v47 }
0x133d   :  { %3027 = vmatprep.subr.bf16.mxu0 %v3445_v4 }
0x133f   :  { %3316 = vrot.lane.b32.xlu1 %v3315_v18, %s3452_s8  ;;  %1864 = vperm.xlu0 %3103, %v893_v48  }
0x1343   :  { %3326 = vrot.lane.b32.xlu1 %v3325_v46, %s3452_s8  ;;  %1859 = vperm.xlu0 %3103, %v892_v13  }
0x1347   :  { %1869 = vperm.xlu1 %3104, %v894_v50  }
0x134b   :  { %1854 = vperm.xlu1 %3104, %v891_v51  }
0x134f   :  { %3330 = vset.pattern.permute.xlu1 %v3446_v6 }
0x1395   :  { %v3292_v52 = vpop.permute.xlu0 %3291 }
0x1396   :  { %v3294_v53 = vunpack.i.h.bf16 %v3292_v52  ;;  %v3293_v54 = vunpack.i.l.bf16 %v3292_v52  ;;  %v2009_v52 = vld [vmem:[#allocation5 + $0x4f0] sm:$0xff] }
0x1398   :  { %v3028_v55 = vpack.c.bf16 %v3294_v53, %v3293_v54  ;;  %v2015_v53 = vrot.slane %v2009_v52, 4 }
0x139a   :  { %3029 = vmatpush1.bf16.msra.mxu0 %v3028_v55  ;;  %2799 = vmatpush3.msk.msra.mxu1 %vm1462_vm9, %v2015_v53 }
0x139b   :  { %3030 = vmatprep.subr.bf16.mxu0 %v3445_v4  ;;  %2803 = vmatprep.subr.mxu1 %v3448_v7 }
0x139d   :  { %v3297_v56 = vpop.permute.xlu1 %3296 }
0x139e   :  { %v3299_v57 = vunpack.i.h.bf16 %v3297_v56  ;;  %v3298_v58 = vunpack.i.l.bf16 %v3297_v56 }
0x13a0   :  { %v3031_v59 = vpack.c.bf16 %v3299_v57, %v3298_v58 }
0x13a2   :  { %3032 = vmatpush1.bf16.msra.mxu0 %v3031_v59 }
0x13a3   :  { %3033 = vmatprep.subr.bf16.mxu0 %v3445_v4 }
0x13a5   :  { %v3302_v60 = vpop.permute.xlu0 %3301 }
0x13a6   :  { %v3304_v61 = vunpack.i.h.bf16 %v3302_v60  ;;  %v3303_v62 = vunpack.i.l.bf16 %v3302_v60 }
0x13a8   :  { %v3034_v63 = vpack.c.bf16 %v3304_v61, %v3303_v62 }
0x13a9   :  { %v3312_v6 = vpop.permute.xlu0 %3311 }
0x13aa   :  { %3035 = vmatpush1.bf16.msra.mxu0 %v3034_v63  ;;  %v3314_v3 = vunpack.i.h.bf16 %v3312_v6  ;;  %v3313_v5 = vunpack.i.l.bf16 %v3312_v6 }
0x13ab   :  { %3036 = vmatprep.subr.bf16.mxu0 %v3445_v4 }
0x13ac   :  { %v3040_v10 = vpack.c.bf16 %v3314_v3, %v3313_v5 }
0x13ad   :  { %v3307_v0 = vpop.permute.xlu1 %3306  ;;  %v3322_v40 = vpop.permute.xlu0 %3321 }
0x13ae   :  { %v3309_v1 = vunpack.i.h.bf16 %v3307_v0  ;;  %v3308_v2 = vunpack.i.l.bf16 %v3307_v0  ;;  %v3324_v42 = vunpack.i.h.bf16 %v3322_v40  ;;  %v3323_v16 = vunpack.i.l.bf16 %v3322_v40  ;;  %v2412_v40 = vld [vmem:[#allocation5 + $0x530] sm:$0xff] }
0x13b0   :  { %v3037_v8 = vpack.c.bf16 %v3309_v1, %v3308_v2  ;;  %v3046_v19 = vpack.c.bf16 %v3324_v42, %v3323_v16 }
0x13b1   :  { %v3317_v9 = vpop.permute.xlu1 %3316 }
0x13b2   :  { %3038 = vmatpush1.bf16.msra.mxu0 %v3037_v8  ;;  %v3319_v11 = vunpack.i.h.bf16 %v3317_v9  ;;  %v3318_v12 = vunpack.i.l.bf16 %v3317_v9 }
0x13b3   :  { %3039 = vmatprep.subr.bf16.mxu0 %v3445_v4 }
0x13b4   :  { %v3043_v17 = vpack.c.bf16 %v3319_v11, %v3318_v12 }
0x13b5   :  { %v3327_v18 = vpop.permute.xlu1 %3326 }
0x13b6   :  { %3041 = vmatpush1.bf16.msra.mxu0 %v3040_v10  ;;  %v3329_v20 = vunpack.i.h.bf16 %v3327_v18  ;;  %v3328_v21 = vunpack.i.l.bf16 %v3327_v18 }
0x13b7   :  { %3042 = vmatprep.subr.bf16.mxu0 %v3445_v4 }
0x13b8   :  { %v3049_v22 = vpack.c.bf16 %v3329_v20, %v3328_v21 }
0x13ba   :  { %3044 = vmatpush1.bf16.msra.mxu0 %v3043_v17 }
0x13bb   :  { %3045 = vmatprep.subr.bf16.mxu0 %v3445_v4 }
0x13be   :  { %3047 = vmatpush1.bf16.msra.mxu0 %v3046_v19  ;;  %v1865_v34 = vpop.permute.xlu0 %1864 }
0x13bf   :  { %3048 = vmatprep.subr.bf16.mxu0 %v3445_v4  ;;  %v885_v4 = vld [vmem:[#allocation5 + $0x430] sm:$0xff] }
0x13c2   :  { %3050 = vmatpush1.bf16.msra.mxu0 %v3049_v22  ;;  %v1860_v39 = vpop.permute.xlu0 %1859  ;;  %v2338_v22 = vld [vmem:[#allocation5 + $0x510] sm:$0x3] }
0x13c3   :  { %2823 = vmatprep.subr.mxu0 %v3448_v7 }
0x13c5   :  { %1949 = vmatmul.mubr.f32.vlgmr.msra.gmra.mrb[22].mxu0 %v879_v23  ;;  %v2487_v23 = vlaneseq }
0x13c6   :  { %2570 = vmatprep.mubr.msk.f32.mxu0 %vm1307_vm7, %v882_v24  ;;  %v1870_v38 = vpop.permute.xlu1 %1869  ;;  %2824 = vmatpush3.msra.mxu0 %v2412_v40  ;;  %v3462_v24 = vmov 15  }
0x13c9   :  { %1954 = vmatmul.mubr.f32.gmra.mrb[24].mxu0 %v881_v25  ;;  %v2488_v25 = vshrl.u32 %v2487_v23, 7 }
0x13ca   :  { %2571 = vmatprep.mubr.msk.f32.mxu0 %vm1307_vm7, %v884_v26  ;;  %v1855_v47 = vpop.permute.xlu1 %1854  ;;  %v2583_v26 = vld [vmem:[#allocation2 + $0x3] ss:$0 sm:$0xff] }
0x13cb   :  { %vm2497_vm4 = vcmp.eq.s32.totalorder %v2488_v25, 1 }
0x13cd   :  { %1959 = vmatmul.mubr.f32.gmra.mrb[26].mxu0 %v883_v27  ;;  %v2584_v27 = vld [vmem:[#allocation2 + $0x7] ss:$0 sm:$0xff] }
0x13ce   :  { %2572 = vmatprep.mubr.msk.f32.mxu0 %vm1307_vm7, %v886_v28 }
0x13d1   :  { %1964 = vmatmul.mubr.f32.gmra.mrb[28].mxu0 %v885_v4 }
0x13d2   :  { %2825 = vmatprep.mubr.msk.f32.mxu0 %vm3447_vm0, %v3448_v7 }
0x1498   :  { %v1950_v30 = vpop.f32.mrb[22].mxu0 }
0x1499   :  { %v1952_v31 = vpop.f32.mrb[23].mxu0  ;;  %v1951_v48 = vadd.f32 %v1950_v30, %v1855_v47 }
0x149a   :  { %v2413_v31 = vld [vmem:[#allocation5 + $0x520] ss:$0 sm:$0xff] }
0x149c   :  { %v1955_v36 = vpop.f32.mrb[24].mxu0 }
0x149d   :  { %v1957_v37 = vpop.f32.mrb[25].mxu0  ;;  %v1956_v43 = vadd.f32 %v1955_v36, %v1860_v39 }
0x14a0   :  { %v1960_v15 = vpop.f32.mrb[26].mxu0 }
0x14a1   :  { %v1961_v41 = vadd.f32 %v1960_v15, %v1865_v34  ;;  %v1962_v14 = vpop.f32.mrb[27].mxu0 }
0x14a3   :  { %3360 = vtanh.f32 %v1961_v41 }
0x14a4   :  { %v1965_v44 = vpop.f32.mrb[28].mxu0  ;;  %3362 = vtanh.f32 %v1956_v43 }
0x14a5   :  { %v1966_v45 = vadd.f32 %v1965_v44, %v1870_v38  ;;  %v1967_v46 = vpop.f32.mrb[29].mxu0 }
0x14a7   :  { %3364 = vtanh.f32 %v1966_v45 }
0x14a8   :  { %3366 = vtanh.f32 %v1951_v48 }
0x14ad   :  { %v3361_v13 = vpop.eup %3360 }
0x14ae   :  { %1985 = vrot.lane.b32.xlu0 %v3361_v13, %s3459_s15  ;;  %v3363_v49 = vpop.eup %3362 }
0x14b1   :  { %v3365_v50 = vpop.eup %3364 }
0x14b2   :  { %1987 = vrot.lane.b32.xlu1 %v3365_v50, %s3459_s15  ;;  %1977 = vrot.lane.b32.xlu0 %v3363_v49, %s3454_s10  ;;  %v3367_v51 = vpop.eup %3366 }
0x14b6   :  { %1975 = vrot.lane.b32.xlu1 %v3367_v51, %s3454_s10 }
0x1520   :  { %v1986_v54 = vpop.permute.xlu0 %1985 }
0x1521   :  { %v1991_v55 = vsub.f32 %v3644_v33, %v1986_v54 }
0x1523   :  { %1995 = vrot.lane.b32.xlu0 %v1991_v55, %s3458_s14 }
0x1524   :  { %v1988_v56 = vpop.permute.xlu1 %1987  ;;  %v1978_v57 = vpop.permute.xlu0 %1977 }
0x1525   :  { %v1992_v58 = vsub.f32 %v3649_v35, %v1988_v56  ;;  %v1982_v59 = vadd.f32 %v1978_v57, %v3641_v32  ;;  %v2325_v32 = vld [vmem:[#allocation5 + $0x4e0] sm:$0xff] }
0x1527   :  { %v2002_v60 = vadd.f32 %v1982_v59, %v1982_v59  ;;  %1997 = vrot.lane.b32.xlu1 %v1992_v58, %s3458_s14 }
0x1528   :  { %v1976_v61 = vpop.permute.xlu1 %1975 }
0x1529   :  { %v2006_v62 = vmax.f32 %v2002_v60, 0.0  ;;  %v1981_v63 = vadd.f32 %v1976_v61, %v3637_v29  ;;  %v2010_v29 = vld [vmem:[#allocation5 + $0x500] sm:$0xff] }
0x152a   :  { %v2249_v10 = vrot.slane %v2010_v29, 4 }
0x152b   :  { %v2001_v6 = vadd.f32 %v1981_v63, %v1981_v63  ;;  %2012 = vrot.lane.b32.xlu0 %v2006_v62, %s3450_s6 }
0x152d   :  { %v2005_v0 = vmax.f32 %v2001_v6, 0.0 }
0x152f   :  { %2091 = vrot.lane.b32.xlu1 %v2005_v0, %s3450_s6 }
0x1595   :  { %v1996_v33 = vpop.permute.xlu0 %1995 }
0x1596   :  { %v2003_v1 = vadd.f32 %v1996_v33, %v1996_v33 }
0x1598   :  { %v2007_v2 = vmax.f32 %v2003_v1, 0.0 }
0x1599   :  { %v1998_v3 = vpop.permute.xlu1 %1997 }
0x159a   :  { %v2004_v35 = vadd.f32 %v1998_v3, %v1998_v3  ;;  %2168 = vrot.lane.b32.xlu0 %v2007_v2, %s3450_s6 }
0x159c   :  { %v2008_v5 = vmax.f32 %v2004_v35, 0.0 }
0x159d   :  { %v2013_v8 = vpop.permute.xlu0 %2012 }
0x159e   :  { %2328 = vperm.xlu0 %3103, %v2325_v32   ;;  %2801 = vmatmul.mubr.msk.f32.vlgmr.msra.gmra.mrb[40].mxu1 %vm1453_vm10, %v2013_v8 }
0x159f   :  { %2247 = vrot.lane.b32.xlu1 %v2008_v5, %s3450_s6  ;;  %2804 = vmatpush3.msk.msra.mxu1 %vm1462_vm9, %v2009_v52 }
0x15a0   :  { %2805 = vmatprep.mubr.msk.f32.mxu1 %vm3447_vm0, %v3448_v7  ;;  %2808 = vmatprep.subr.mxu1 %v3448_v7 }
0x15a1   :  { %v2092_v9 = vpop.permute.xlu1 %2091 }
0x15a2   :  { %3331 = vset.pattern.permute.xlu0 %v3462_v24 }
0x15a3   :  { %2333 = vperm.xlu1 %3330, %v2325_v32  }
0x15a6   :  { %2806 = vmatmul.mubr.msk.f32.vlgmr.msra.gmra.mrb[40].mxu1 %vm1453_vm10, %v2092_v9 }
0x15a7   :  { %2809 = vmatpush3.msk.msra.mxu1 %vm1462_vm9, %v2010_v29  ;;  %2810 = vmatprep.mubr.msk.f32.mxu1 %vm3447_vm0, %v3448_v7 }
0x15a8   :  { %2813 = vmatprep.subr.mxu1 %v3448_v7 }
0x160c   :  { %v2169_v11 = vpop.permute.xlu0 %2168 }
0x160d   :  { %2811 = vmatmul.mubr.msk.f32.vlgmr.msra.gmra.mrb[40].mxu1 %vm1453_vm10, %v2169_v11 }
0x160e   :  { %2814 = vmatpush3.msk.msra.mxu1 %vm1462_vm9, %v2249_v10  ;;  %2815 = vmatprep.mubr.msk.f32.mxu1 %vm3447_vm0, %v3448_v7 }
0x160f   :  { %2818 = vmatprep.subr.mxu1 %v3448_v7 }
0x1611   :  { %v2248_v12 = vpop.permute.xlu1 %2247 }
0x1615   :  { %2816 = vmatmul.mubr.msk.f32.vlgmr.msra.gmra.mrb[40].mxu1 %vm1453_vm10, %v2248_v12 }
0x1616   :  { %2820 = vmatprep.mubr.msk.f32.mxu1 %vm3447_vm0, %v3448_v7  ;;  %vm2490_vm0 = vcmp.eq.s32.totalorder %v2488_v25, 0 }
0x1617   :  { %v2495_v7 = vsel %vm2490_vm0, %v2583_v26, 0.0 }
0x1618   :  { %v2502_v28 = vsel %vm2497_vm4, %v2584_v27, %v2495_v7 }
0x1619   :  { %2505 = vperm.xlu0 %3331, %v2502_v28  }
0x161d   :  { %v2329_v42 = vpop.permute.xlu0 %2328 }
0x1622   :  { %v2334_v17 = vpop.permute.xlu1 %2333 }
0x1698   :  { %v2506_v36 = vpop.permute.xlu0 %2505 }
0x16e8   :  { %v2320_v16 = vpop.f32.mrb[40].mxu1 }
0x16e9   :  { %v2331_v18 = vmul.f32 %v2329_v42, %v2320_v16  ;;  %v2817_v19 = vpop.f32.mrb[41].mxu1 }
0x16eb   :  { %v2336_v20 = vadd.f32 %v2334_v17, %v2331_v18 }
0x16ed   :  { %v2337_v21 = vmax.f32 %v2336_v20, 0.0 }
0x16ef   :  { %2819 = vmatpush3.msra.mxu1 %v2337_v21 }
0x16f0   :  { %2821 = vmatmul.mubr.msk.f32.vlgmr.msra.gmra.mrb[42].mxu1 %vm454_vm8, %v2338_v22 }
0x17c3   :  { %v2408_v4 = vpop.f32.mrb[42].mxu1 }
0x17c4   :  { %v2822_v30 = vpop.f32.mrb[43].mxu1  ;;  %2826 = vmatmul.mubr.msk.f32.vlgmr.msra.gmra.mrb[30].mxu0 %vm454_vm8, %v2408_v4 }
0x1897   :  { %v2483_v34 = vpop.f32.mrb[30].mxu0 }
0x1898   :  { %v2484_v37 = vadd.f32 %v2483_v34, %v2413_v31  ;;  %v2827_v38 = vpop.f32.mrb[31].mxu0 }
0x189a   :  { %v2508_v15 = vadd.f32 %v2506_v36, %v2484_v37 }
0x189c   :  { %2510 = vst.msk [vmem:[#allocation7] sm:$0x3] %vm2509_vm5, %v2508_v15 }
0x189d   :  { %3423 = shalt.err (!%p3420_p6)
}
0x189e   :  { %s3424_s23 = scalar_lea.hbm %s3761_s2, 32 }
0x189f   :  { %p3425_p7 = scmp.ne.s32.totalorder %s3761_s2, %s3424_s23  ;;  %p3428_p8 = scmp.lt.u32.totalorder %s3424_s23, %s3761_s2 }
0x18a1   :  { %p3430_p9 = pnand %p3428_p8, %p3425_p7 }
0x18a3   :  { %3433 = shalt.err (!%p3430_p9)
}
0x18a4   :  { %2520 = dma.vmem_to_hbm [thread:$0]  %s2518_s19, 32, %s3761_s2, [#allocation4]  }
0x18a5   :  { %3438 = dma.done.wait [#allocation4], 32  }
0x18a6   :  { %3439 = vsyncadd [#allocation4], 4294967264 }
0x18a7   :  { %2524 = vsyncpa [#allocation3], 1 }
0x18a8   :  { %2525 = vsyncpa [#allocation6], 1 }
0x18a9   :  { %2526 = vsyncpa [#allocation4], 1 }

</bundles_post_ra>
